<compile_context>
chip_gen: v5e
topology: v5e:2x2
jax: 0.10.0
libtpu: 0.0.40
codegen_flags: <defaults>
</compile_context>

<pallas_src>
import functools

import jax
import jax.numpy as jnp
from jax.experimental import pallas as pl
from jax.experimental.pallas import tpu as pltpu


# ----------------------------------------------------------------------------
# Pallas kernel: the full encoder stack.  grid = (batch_blocks,).
# ----------------------------------------------------------------------------
def _encoder_stack_kernel(x_ref, bias_ref,
                          wqkv_ref, bqkv_ref, wo_ref, bo_ref,
                          g1_ref, be1_ref, w1_ref, b1_ref,
                          w2_ref, b2_ref, g2_ref, be2_ref,
                          o_ref, *, n_heads):
    bt, seq, D = x_ref.shape
    n_layers = wqkv_ref.shape[0]
    dh = D // n_heads
    n_rows = bt * seq
    scale = 1.0 / float(dh) ** 0.5

    # Layer-invariant key-padding bias, hoisted out of the layer loop.
    # bias_ref: (bt, 1, S) f32, 0 at valid keys, -1e9 at padded keys.
    bias = bias_ref[...]                                            # (bt, 1, S)
    key_bias = jnp.broadcast_to(bias[:, None, :, :],
                                (bt, n_heads, 1, seq))
    key_bias = key_bias.reshape(bt * n_heads, 1, seq)               # (bt*H,1,S)

    # Activations carried as a value across the whole (static) layer sweep.
    x = x_ref[...].reshape(n_rows, D)                               # (N, D) f32

    for layer in range(n_layers):      # static unroll; n_layers is small
        # --- fused QKV projection: one MXU call per layer ---
        qkv = jnp.dot(x, wqkv_ref[layer],
                      preferred_element_type=jnp.float32) + bqkv_ref[layer]

        # Heads -> leading batch dim via one minor-2D transpose of the whole
        # qkv block, sublane-aligned slices and tile-aligned reshapes.
        qkv_t = jnp.swapaxes(qkv.reshape(bt, seq, 3 * D), 1, 2)     # (bt,3D,S)
        q_t = qkv_t[:, 0 * D:1 * D, :].reshape(bt * n_heads, dh, seq)
        k_t = qkv_t[:, 1 * D:2 * D, :].reshape(bt * n_heads, dh, seq)
        v_t = qkv_t[:, 2 * D:3 * D, :].reshape(bt * n_heads, dh, seq)
        q_h = jnp.swapaxes(q_t, 1, 2)                               # (bt*H,S,dh)

        s = jnp.einsum('bqd,bdk->bqk', q_h, k_t,
                       preferred_element_type=jnp.float32)          # (bt*H,S,S)
        s = s * scale + key_bias
        s = s - jnp.max(s, axis=-1, keepdims=True)
        p = jnp.exp(s)
        p = p * pl.reciprocal(jnp.sum(p, axis=-1, keepdims=True), approx=True)

        a_t = jnp.einsum('bdk,bqk->bdq', v_t, p,
                         preferred_element_type=jnp.float32)        # (bt*H,dh,S)
        a = jnp.swapaxes(a_t.reshape(bt, D, seq), 1, 2).reshape(n_rows, D)

        attn = jnp.dot(a, wo_ref[layer],
                       preferred_element_type=jnp.float32) + bo_ref[layer]

        # residual + LayerNorm 1 (post-norm, f32)
        h = x + attn
        mu = jnp.mean(h, axis=-1, keepdims=True)
        var = jnp.mean((h - mu) ** 2, axis=-1, keepdims=True)
        h1 = (h - mu) * jax.lax.rsqrt(var + 1e-5) * g1_ref[layer] + be1_ref[layer]

        # FFN (ReLU)
        f = jnp.dot(h1, w1_ref[layer],
                    preferred_element_type=jnp.float32) + b1_ref[layer]
        f = jnp.maximum(f, 0.0)
        f = jnp.dot(f, w2_ref[layer],
                    preferred_element_type=jnp.float32) + b2_ref[layer]

        # residual + LayerNorm 2
        y = h1 + f
        mu = jnp.mean(y, axis=-1, keepdims=True)
        var = jnp.mean((y - mu) ** 2, axis=-1, keepdims=True)
        x = (y - mu) * jax.lax.rsqrt(var + 1e-5) * g2_ref[layer] + be2_ref[layer]

    # Single small store at the end of the layer sweep.
    o_ref[...] = x.reshape(bt, seq, D).astype(o_ref.dtype)


def encoder_stack(x, key_bias, layer_weights, n_heads, batch_blocks=1):
    """x: (B, S, D) f32.  key_bias: (B, 1, S) f32 (0 valid / -1e9 padded).

    layer_weights: dict of layer-stacked weights (leading dim = n_layers).
    batch_blocks: keep 1 on v5e/v6e (single TC); 2 on v7x only when the
    per-core batch slice carries real work.
    """
    B, S, D = x.shape
    assert D % n_heads == 0
    assert B % batch_blocks == 0
    bt = B // batch_blocks

    wnames = ["wqkv", "bqkv", "wo", "bo", "g1", "be1",
              "w1", "b1", "w2", "b2", "g2", "be2"]
    weights = [layer_weights[n].astype(jnp.float32) for n in wnames]

    def full_spec(arr):
        nd = arr.ndim
        # Full-array block, same block for every grid step -> DMA'd into VMEM
        # once and revisited (weights are VMEM-resident for the whole call).
        return pl.BlockSpec(arr.shape, lambda b: (0,) * nd)

    in_specs = ([pl.BlockSpec((bt, S, D), lambda b: (b, 0, 0)),
                 pl.BlockSpec((bt, 1, S), lambda b: (b, 0, 0))]
                + [full_spec(w) for w in weights])

    kernel = functools.partial(_encoder_stack_kernel, n_heads=n_heads)

    return pl.pallas_call(
        kernel,
        out_shape=jax.ShapeDtypeStruct((B, S, D), jnp.float32),
        grid_spec=pltpu.PrefetchScalarGridSpec(
            num_scalar_prefetch=0,
            grid=(batch_blocks,),
            in_specs=in_specs,
            out_specs=pl.BlockSpec((bt, S, D), lambda b: (b, 0, 0)),
        ),
        compiler_params=pltpu.CompilerParams(
            dimension_semantics=("parallel",)),
    )(x, key_bias, *weights)


# ----------------------------------------------------------------------------
# Plain-JAX glue: sinusoidal encoders, embedding lookup, ctx gather.
# ----------------------------------------------------------------------------
def float_encode(x, d):
    """Sinusoidal encoding of floats.  x: (...,) -> (..., d)."""
    half = d // 2
    i = jnp.arange(half, dtype=jnp.float32)
    inv_freq = 1.0 / (10000.0 ** (i / half))
    ang = x[..., None].astype(jnp.float32) * inv_freq
    return jnp.concatenate([jnp.sin(ang), jnp.cos(ang)], axis=-1)


def peak_encode(spectra, w_int, d):
    """spectra: (B, P, 2) [m/z, intensity] -> (B, P, d)."""
    mz_enc = float_encode(spectra[..., 0], d)                 # (B, P, d)
    int_enc = spectra[..., 1:2] @ w_int                       # (B, P, d)
    return mz_enc + int_enc


def base_model_encoder_forward(spectra, masks, precursors, params, cfg):
    latent_dim = cfg["latent_dim"]
    n_heads = cfg["n_heads"]
    max_charge = cfg["max_charge"]
    default_charge = cfg["default_charge"]
    batch_blocks = cfg.get("batch_blocks", 1)

    # PeakEncoder
    peaks = peak_encode(spectra, params["peak_w_int"], latent_dim)   # (B, P, d)

    # latent spectrum token
    B = spectra.shape[0]
    latent = jnp.broadcast_to(params["latent_spectrum"], (B, 1, latent_dim))
    peaks = jnp.concatenate([latent, peaks], axis=1)                 # (B, 1+P, d)

    # precursor token = mass encoding + charge embedding
    masses = float_encode(precursors[:, None, 0], latent_dim)        # (B, 1, d)
    charges = precursors[:, 1].astype(jnp.int32) - 1
    charges = jnp.where(charges <= 0, default_charge, charges)
    charges = jnp.where(charges >= max_charge, default_charge, charges)
    charge_emb = jnp.take(params["charge_emb"], charges, axis=0)     # (B, d)
    prec_tok = masses + charge_emb[:, None, :]                       # (B, 1, d)
    x = jnp.concatenate([prec_tok, peaks], axis=1)                   # (B, 2+P, d)

    # transformer stack (single fused Pallas call).  The key-padding bias is
    # built directly from `masks` (exact torch key_mask semantics; an
    # all-valid mask gives an all-zero bias == the torch key_mask=None path).
    key_bias = jnp.where(masks[:, None, :] == 0, -1e9, 0.0).astype(jnp.float32)
    x = encoder_stack(x, key_bias, params["layers"], n_heads,
                      batch_blocks=batch_blocks)

    x = x * masks[:, :, None]

    lens = jnp.sum(masks, axis=1).astype(jnp.int32)                  # (B,)
    idx = lens - 1
    ctx = jnp.take_along_axis(x, idx[:, None, None], axis=1)[:, 0]   # (B, d)
    return x, ctx


# ----------------------------------------------------------------------------
# Deterministic parameter construction (synthetic, no checkpoint loading).
# Per-layer weights are built already stacked on a leading n_layers axis with
# Q/K/V fused into one (D, 3D) matrix.
# ----------------------------------------------------------------------------
def init_params(key, dim, n_layers, latent_dim, hidden_size, max_charge):
    def nrm(k, shape, scale=0.05):
        return (scale * jax.random.normal(k, shape)).astype(jnp.float32)

    keys = jax.random.split(key, 4)
    D, Hff, L = latent_dim, hidden_size, n_layers
    lk = jax.random.split(keys[3], 4)
    layers = {
        "wqkv": nrm(lk[0], (L, D, 3 * D)),
        "bqkv": jnp.zeros((L, 1, 3 * D), jnp.float32),
        "wo":   nrm(lk[1], (L, D, D)),
        "bo":   jnp.zeros((L, 1, D), jnp.float32),
        "g1":   jnp.ones((L, 1, D), jnp.float32),
        "be1":  jnp.zeros((L, 1, D), jnp.float32),
        "w1":   nrm(lk[2], (L, D, Hff)),
        "b1":   jnp.zeros((L, 1, Hff), jnp.float32),
        "w2":   nrm(lk[3], (L, Hff, D)),
        "b2":   jnp.zeros((L, 1, D), jnp.float32),
        "g2":   jnp.ones((L, 1, D), jnp.float32),
        "be2":  jnp.zeros((L, 1, D), jnp.float32),
    }
    params = {
        "latent_spectrum": nrm(keys[0], (1, 1, latent_dim), 1.0),
        "charge_emb": nrm(keys[1], (max_charge + 1, latent_dim), 1.0),
        "peak_w_int": nrm(keys[2], (1, latent_dim)),
        "layers": layers,
    }
    return params


if __name__ == "__main__":
    # Module hyperparams: dim=64 -> latent_dim=32, n_layers=2, n_heads=4.
    dim, n_layers, n_heads, max_charge, default_charge = 64, 2, 4, 10, 1
    latent_dim = dim // 2
    cfg = dict(latent_dim=latent_dim, n_heads=n_heads,
               max_charge=max_charge, default_charge=default_charge,
               batch_blocks=1)   # 2 only on v7x with real (large) batches

    B, n_peaks = 2, 14                      # sequence length = n_peaks + 2 = 16
    key = jax.random.PRNGKey(0)
    k_par, k_mz, k_int, k_mass, k_chg = jax.random.split(key, 5)

    params = init_params(k_par, dim, n_layers, latent_dim, dim, max_charge)

    mz = jax.random.uniform(k_mz, (B, n_peaks, 1), minval=50.0, maxval=1500.0)
    inten = jax.random.uniform(k_int, (B, n_peaks, 1), minval=0.0, maxval=1.0)
    spectra = jnp.concatenate([mz, inten], axis=-1).astype(jnp.float32)

    mass = jax.random.uniform(k_mass, (B, 1), minval=300.0, maxval=2000.0)
    charge = jax.random.randint(k_chg, (B, 1), 1, 5).astype(jnp.float32)
    precursors = jnp.concatenate([mass, charge], axis=-1).astype(jnp.float32)

    # padding masks over the full (precursor + latent + peaks) sequence
    seq_len = n_peaks + 2
    valid_lens = jnp.array([seq_len, seq_len - 4], dtype=jnp.int32)
    masks = (jnp.arange(seq_len)[None, :] < valid_lens[:, None]).astype(jnp.float32)

    x, ctx = base_model_encoder_forward(spectra, masks, precursors, params, cfg)
    jax.block_until_ready((x, ctx))
    assert x.shape == (B, seq_len, latent_dim)
    assert ctx.shape == (B, latent_dim)
    print("KERNEL_OK")
</pallas_src>

<mosaic_0001>
module attributes {stable_mosaic.version = 11 : i64} {
  func.func @_encoder_stack_kernel(%arg0: i32, %arg1: memref<2x16x32xf32, #tpu.memory_space<vmem>>, %arg2: memref<2x1x16xf32, #tpu.memory_space<vmem>>, %arg3: memref<2x32x96xf32, #tpu.memory_space<vmem>>, %arg4: memref<2x1x96xf32, #tpu.memory_space<vmem>>, %arg5: memref<2x32x32xf32, #tpu.memory_space<vmem>>, %arg6: memref<2x1x32xf32, #tpu.memory_space<vmem>>, %arg7: memref<2x1x32xf32, #tpu.memory_space<vmem>>, %arg8: memref<2x1x32xf32, #tpu.memory_space<vmem>>, %arg9: memref<2x32x64xf32, #tpu.memory_space<vmem>>, %arg10: memref<2x1x64xf32, #tpu.memory_space<vmem>>, %arg11: memref<2x64x32xf32, #tpu.memory_space<vmem>>, %arg12: memref<2x1x32xf32, #tpu.memory_space<vmem>>, %arg13: memref<2x1x32xf32, #tpu.memory_space<vmem>>, %arg14: memref<2x1x32xf32, #tpu.memory_space<vmem>>, %arg15: memref<2x16x32xf32, #tpu.memory_space<vmem>>) attributes {dimension_semantics = [#tpu.dimension_semantics<parallel>], iteration_bounds = array<i64: 1>, scalar_prefetch = 0 : i64, scratch_operands = 0 : i64, tpu.core_type = #tpu.core_type<tc>, window_params = [{transform_indices = @transform_0, window_bounds = array<i64: 2, 16, 32>}, {transform_indices = @transform_1, window_bounds = array<i64: 2, 1, 16>}, {pipeline_mode = #tpu.pipeline_mode<synchronous>, transform_indices = @transform_2, window_bounds = array<i64: 2, 32, 96>}, {pipeline_mode = #tpu.pipeline_mode<synchronous>, transform_indices = @transform_3, window_bounds = array<i64: 2, 1, 96>}, {pipeline_mode = #tpu.pipeline_mode<synchronous>, transform_indices = @transform_4, window_bounds = array<i64: 2, 32, 32>}, {pipeline_mode = #tpu.pipeline_mode<synchronous>, transform_indices = @transform_5, window_bounds = array<i64: 2, 1, 32>}, {pipeline_mode = #tpu.pipeline_mode<synchronous>, transform_indices = @transform_6, window_bounds = array<i64: 2, 1, 32>}, {pipeline_mode = #tpu.pipeline_mode<synchronous>, transform_indices = @transform_7, window_bounds = array<i64: 2, 1, 32>}, {pipeline_mode = #tpu.pipeline_mode<synchronous>, transform_indices = @transform_8, window_bounds = array<i64: 2, 32, 64>}, {pipeline_mode = #tpu.pipeline_mode<synchronous>, transform_indices = @transform_9, window_bounds = array<i64: 2, 1, 64>}, {pipeline_mode = #tpu.pipeline_mode<synchronous>, transform_indices = @transform_10, window_bounds = array<i64: 2, 64, 32>}, {pipeline_mode = #tpu.pipeline_mode<synchronous>, transform_indices = @transform_11, window_bounds = array<i64: 2, 1, 32>}, {pipeline_mode = #tpu.pipeline_mode<synchronous>, transform_indices = @transform_12, window_bounds = array<i64: 2, 1, 32>}, {pipeline_mode = #tpu.pipeline_mode<synchronous>, transform_indices = @transform_13, window_bounds = array<i64: 2, 1, 32>}, {transform_indices = @transform_14, window_bounds = array<i64: 2, 16, 32>}]} {
    %c0 = arith.constant 0 : index
    %c0_0 = arith.constant 0 : index
    %c0_1 = arith.constant 0 : index
    %0 = vector.load %arg2[%c0, %c0_0, %c0_1] : memref<2x1x16xf32, #tpu.memory_space<vmem>>, vector<2x1x16xf32>
    %1 = vector.shape_cast %0 : vector<2x1x16xf32> to vector<2x1x1x16xf32>
    %2 = vector.shape_cast %1 : vector<2x1x1x16xf32> to vector<2x1x1x16xf32>
    %3 = vector.broadcast %2 : vector<2x1x1x16xf32> to vector<2x4x1x16xf32>
    %4 = vector.shape_cast %3 : vector<2x4x1x16xf32> to vector<8x1x16xf32>
    %c0_2 = arith.constant 0 : index
    %c0_3 = arith.constant 0 : index
    %c0_4 = arith.constant 0 : index
    %5 = vector.load %arg1[%c0_2, %c0_3, %c0_4] : memref<2x16x32xf32, #tpu.memory_space<vmem>>, vector<2x16x32xf32>
    %6 = vector.shape_cast %5 : vector<2x16x32xf32> to vector<32x32xf32>
    %c0_5 = arith.constant 0 : index
    %c0_6 = arith.constant 0 : index
    %c0_7 = arith.constant 0 : index
    %7 = vector.load %arg3[%c0_5, %c0_6, %c0_7] : memref<2x32x96xf32, #tpu.memory_space<vmem>>, vector<1x32x96xf32>
    %8 = vector.shape_cast %7 : vector<1x32x96xf32> to vector<32x96xf32>
    %cst = arith.constant dense<0.000000e+00> : vector<32x96xf32>
    %9 = tpu.matmul %6, %8, %cst {dimension_numbers = #tpu.dot_dimension_numbers<[1], [0], [0], [1], [0, 0, 1, 1], [], []>} : vector<32x32xf32>, vector<32x96xf32>, vector<32x96xf32> -> vector<32x96xf32>
    %c0_8 = arith.constant 0 : index
    %c0_9 = arith.constant 0 : index
    %c0_10 = arith.constant 0 : index
    %10 = vector.load %arg4[%c0_8, %c0_9, %c0_10] : memref<2x1x96xf32, #tpu.memory_space<vmem>>, vector<1x1x96xf32>
    %11 = vector.shape_cast %10 : vector<1x1x96xf32> to vector<1x96xf32>
    %12 = vector.broadcast %11 : vector<1x96xf32> to vector<32x96xf32>
    %13 = arith.addf %9, %12 : vector<32x96xf32>
    %14 = vector.shape_cast %13 : vector<32x96xf32> to vector<2x16x96xf32>
    %15 = tpu.transpose %14, [0, 2, 1] : vector<2x16x96xf32> -> vector<2x96x16xf32>
    %16 = vector.extract_strided_slice %15 {offsets = [0, 0, 0], sizes = [2, 32, 16], strides = [1, 1, 1]} : vector<2x96x16xf32> to vector<2x32x16xf32>
    %17 = vector.shape_cast %16 : vector<2x32x16xf32> to vector<8x8x16xf32>
    %18 = vector.extract_strided_slice %15 {offsets = [0, 32, 0], sizes = [2, 32, 16], strides = [1, 1, 1]} : vector<2x96x16xf32> to vector<2x32x16xf32>
    %19 = vector.shape_cast %18 : vector<2x32x16xf32> to vector<8x8x16xf32>
    %20 = vector.extract_strided_slice %15 {offsets = [0, 64, 0], sizes = [2, 32, 16], strides = [1, 1, 1]} : vector<2x96x16xf32> to vector<2x32x16xf32>
    %21 = vector.shape_cast %20 : vector<2x32x16xf32> to vector<8x8x16xf32>
    %22 = tpu.transpose %17, [0, 2, 1] : vector<8x8x16xf32> -> vector<8x16x8xf32>
    "tpu.trace_start"() <{level = 10 : i32, message = "bqd,bdk->bqk"}> : () -> ()
    %cst_11 = arith.constant dense<0.000000e+00> : vector<8x16x16xf32>
    %23 = tpu.matmul %22, %19, %cst_11 {dimension_numbers = #tpu.dot_dimension_numbers<[2], [1], [1], [2], [0, 0, 0, 1, 1, 2], [0], [0]>} : vector<8x16x8xf32>, vector<8x8x16xf32>, vector<8x16x16xf32> -> vector<8x16x16xf32>
    "tpu.trace_stop"() : () -> ()
    %cst_12 = arith.constant 0.353553385 : f32
    %24 = vector.broadcast %cst_12 : f32 to vector<8x16x16xf32>
    %25 = arith.mulf %23, %24 : vector<8x16x16xf32>
    %26 = vector.broadcast %4 : vector<8x1x16xf32> to vector<8x16x16xf32>
    %27 = arith.addf %25, %26 : vector<8x16x16xf32>
    %cst_13 = arith.constant dense<0xFF800000> : vector<8x16xf32>
    %28 = vector.multi_reduction <maximumf>, %27, %cst_13 [2] : vector<8x16x16xf32> to vector<8x16xf32>
    %29 = vector.shape_cast %28 : vector<8x16xf32> to vector<8x16x1xf32>
    %30 = vector.broadcast %29 : vector<8x16x1xf32> to vector<8x16x16xf32>
    %31 = arith.subf %27, %30 : vector<8x16x16xf32>
    %32 = math.exp %31 : vector<8x16x16xf32>
    %cst_14 = arith.constant dense<0.000000e+00> : vector<8x16xf32>
    %33 = vector.multi_reduction <add>, %32, %cst_14 [2] : vector<8x16x16xf32> to vector<8x16xf32>
    %34 = vector.shape_cast %33 : vector<8x16xf32> to vector<8x16x1xf32>
    %35 = tpu.reciprocal %34 {approx = true} : vector<8x16x1xf32> -> vector<8x16x1xf32>
    %36 = vector.broadcast %35 : vector<8x16x1xf32> to vector<8x16x16xf32>
    %37 = arith.mulf %32, %36 : vector<8x16x16xf32>
    "tpu.trace_start"() <{level = 10 : i32, message = "bdk,bqk->bdq"}> : () -> ()
    %cst_15 = arith.constant dense<0.000000e+00> : vector<8x8x16xf32>
    %38 = tpu.matmul %21, %37, %cst_15 {dimension_numbers = #tpu.dot_dimension_numbers<[2], [2], [1], [1], [0, 0, 0, 1, 1, 1], [0], [0]>} : vector<8x8x16xf32>, vector<8x16x16xf32>, vector<8x8x16xf32> -> vector<8x8x16xf32>
    "tpu.trace_stop"() : () -> ()
    %39 = vector.shape_cast %38 : vector<8x8x16xf32> to vector<2x32x16xf32>
    %40 = tpu.transpose %39, [0, 2, 1] : vector<2x32x16xf32> -> vector<2x16x32xf32>
    %41 = vector.shape_cast %40 : vector<2x16x32xf32> to vector<32x32xf32>
    %c0_16 = arith.constant 0 : index
    %c0_17 = arith.constant 0 : index
    %c0_18 = arith.constant 0 : index
    %42 = vector.load %arg5[%c0_16, %c0_17, %c0_18] : memref<2x32x32xf32, #tpu.memory_space<vmem>>, vector<1x32x32xf32>
    %43 = vector.shape_cast %42 : vector<1x32x32xf32> to vector<32x32xf32>
    %cst_19 = arith.constant dense<0.000000e+00> : vector<32x32xf32>
    %44 = tpu.matmul %41, %43, %cst_19 {dimension_numbers = #tpu.dot_dimension_numbers<[1], [0], [0], [1], [0, 0, 1, 1], [], []>} : vector<32x32xf32>, vector<32x32xf32>, vector<32x32xf32> -> vector<32x32xf32>
    %c0_20 = arith.constant 0 : index
    %c0_21 = arith.constant 0 : index
    %c0_22 = arith.constant 0 : index
    %45 = vector.load %arg6[%c0_20, %c0_21, %c0_22] : memref<2x1x32xf32, #tpu.memory_space<vmem>>, vector<1x1x32xf32>
    %46 = vector.shape_cast %45 : vector<1x1x32xf32> to vector<1x32xf32>
    %47 = vector.broadcast %46 : vector<1x32xf32> to vector<32x32xf32>
    %48 = arith.addf %44, %47 : vector<32x32xf32>
    %49 = arith.addf %6, %48 : vector<32x32xf32>
    %cst_23 = arith.constant dense<0.000000e+00> : vector<32xf32>
    %50 = vector.multi_reduction <add>, %49, %cst_23 [1] : vector<32x32xf32> to vector<32xf32>
    %51 = vector.shape_cast %50 : vector<32xf32> to vector<32x1xf32>
    %cst_24 = arith.constant 3.200000e+01 : f32
    %52 = vector.broadcast %cst_24 : f32 to vector<32x1xf32>
    %53 = arith.divf %51, %52 : vector<32x1xf32>
    %54 = vector.broadcast %53 : vector<32x1xf32> to vector<32x32xf32>
    %55 = arith.subf %49, %54 : vector<32x32xf32>
    %56 = arith.mulf %55, %55 : vector<32x32xf32>
    %cst_25 = arith.constant dense<0.000000e+00> : vector<32xf32>
    %57 = vector.multi_reduction <add>, %56, %cst_25 [1] : vector<32x32xf32> to vector<32xf32>
    %58 = vector.shape_cast %57 : vector<32xf32> to vector<32x1xf32>
    %cst_26 = arith.constant 3.200000e+01 : f32
    %59 = vector.broadcast %cst_26 : f32 to vector<32x1xf32>
    %60 = arith.divf %58, %59 : vector<32x1xf32>
    %61 = vector.broadcast %53 : vector<32x1xf32> to vector<32x32xf32>
    %62 = arith.subf %49, %61 : vector<32x32xf32>
    %cst_27 = arith.constant 9.99999974E-6 : f32
    %63 = vector.broadcast %cst_27 : f32 to vector<32x1xf32>
    %64 = arith.addf %60, %63 : vector<32x1xf32>
    %65 = math.rsqrt %64 : vector<32x1xf32>
    %66 = vector.broadcast %65 : vector<32x1xf32> to vector<32x32xf32>
    %67 = arith.mulf %62, %66 : vector<32x32xf32>
    %c0_28 = arith.constant 0 : index
    %c0_29 = arith.constant 0 : index
    %c0_30 = arith.constant 0 : index
    %68 = vector.load %arg7[%c0_28, %c0_29, %c0_30] : memref<2x1x32xf32, #tpu.memory_space<vmem>>, vector<1x1x32xf32>
    %69 = vector.shape_cast %68 : vector<1x1x32xf32> to vector<1x32xf32>
    %70 = vector.broadcast %69 : vector<1x32xf32> to vector<32x32xf32>
    %71 = arith.mulf %67, %70 : vector<32x32xf32>
    %c0_31 = arith.constant 0 : index
    %c0_32 = arith.constant 0 : index
    %c0_33 = arith.constant 0 : index
    %72 = vector.load %arg8[%c0_31, %c0_32, %c0_33] : memref<2x1x32xf32, #tpu.memory_space<vmem>>, vector<1x1x32xf32>
    %73 = vector.shape_cast %72 : vector<1x1x32xf32> to vector<1x32xf32>
    %74 = vector.broadcast %73 : vector<1x32xf32> to vector<32x32xf32>
    %75 = arith.addf %71, %74 : vector<32x32xf32>
    %c0_34 = arith.constant 0 : index
    %c0_35 = arith.constant 0 : index
    %c0_36 = arith.constant 0 : index
    %76 = vector.load %arg9[%c0_34, %c0_35, %c0_36] : memref<2x32x64xf32, #tpu.memory_space<vmem>>, vector<1x32x64xf32>
    %77 = vector.shape_cast %76 : vector<1x32x64xf32> to vector<32x64xf32>
    %cst_37 = arith.constant dense<0.000000e+00> : vector<32x64xf32>
    %78 = tpu.matmul %75, %77, %cst_37 {dimension_numbers = #tpu.dot_dimension_numbers<[1], [0], [0], [1], [0, 0, 1, 1], [], []>} : vector<32x32xf32>, vector<32x64xf32>, vector<32x64xf32> -> vector<32x64xf32>
    %c0_38 = arith.constant 0 : index
    %c0_39 = arith.constant 0 : index
    %c0_40 = arith.constant 0 : index
    %79 = vector.load %arg10[%c0_38, %c0_39, %c0_40] : memref<2x1x64xf32, #tpu.memory_space<vmem>>, vector<1x1x64xf32>
    %80 = vector.shape_cast %79 : vector<1x1x64xf32> to vector<1x64xf32>
    %81 = vector.broadcast %80 : vector<1x64xf32> to vector<32x64xf32>
    %82 = arith.addf %78, %81 : vector<32x64xf32>
    %cst_41 = arith.constant 0.000000e+00 : f32
    %83 = vector.broadcast %cst_41 : f32 to vector<32x64xf32>
    %84 = arith.maximumf %82, %83 : vector<32x64xf32>
    %c0_42 = arith.constant 0 : index
    %c0_43 = arith.constant 0 : index
    %c0_44 = arith.constant 0 : index
    %85 = vector.load %arg11[%c0_42, %c0_43, %c0_44] : memref<2x64x32xf32, #tpu.memory_space<vmem>>, vector<1x64x32xf32>
    %86 = vector.shape_cast %85 : vector<1x64x32xf32> to vector<64x32xf32>
    %cst_45 = arith.constant dense<0.000000e+00> : vector<32x32xf32>
    %87 = tpu.matmul %84, %86, %cst_45 {dimension_numbers = #tpu.dot_dimension_numbers<[1], [0], [0], [1], [0, 0, 1, 1], [], []>} : vector<32x64xf32>, vector<64x32xf32>, vector<32x32xf32> -> vector<32x32xf32>
    %c0_46 = arith.constant 0 : index
    %c0_47 = arith.constant 0 : index
    %c0_48 = arith.constant 0 : index
    %88 = vector.load %arg12[%c0_46, %c0_47, %c0_48] : memref<2x1x32xf32, #tpu.memory_space<vmem>>, vector<1x1x32xf32>
    %89 = vector.shape_cast %88 : vector<1x1x32xf32> to vector<1x32xf32>
    %90 = vector.broadcast %89 : vector<1x32xf32> to vector<32x32xf32>
    %91 = arith.addf %87, %90 : vector<32x32xf32>
    %92 = arith.addf %75, %91 : vector<32x32xf32>
    %cst_49 = arith.constant dense<0.000000e+00> : vector<32xf32>
    %93 = vector.multi_reduction <add>, %92, %cst_49 [1] : vector<32x32xf32> to vector<32xf32>
    %94 = vector.shape_cast %93 : vector<32xf32> to vector<32x1xf32>
    %cst_50 = arith.constant 3.200000e+01 : f32
    %95 = vector.broadcast %cst_50 : f32 to vector<32x1xf32>
    %96 = arith.divf %94, %95 : vector<32x1xf32>
    %97 = vector.broadcast %96 : vector<32x1xf32> to vector<32x32xf32>
    %98 = arith.subf %92, %97 : vector<32x32xf32>
    %99 = arith.mulf %98, %98 : vector<32x32xf32>
    %cst_51 = arith.constant dense<0.000000e+00> : vector<32xf32>
    %100 = vector.multi_reduction <add>, %99, %cst_51 [1] : vector<32x32xf32> to vector<32xf32>
    %101 = vector.shape_cast %100 : vector<32xf32> to vector<32x1xf32>
    %cst_52 = arith.constant 3.200000e+01 : f32
    %102 = vector.broadcast %cst_52 : f32 to vector<32x1xf32>
    %103 = arith.divf %101, %102 : vector<32x1xf32>
    %104 = vector.broadcast %96 : vector<32x1xf32> to vector<32x32xf32>
    %105 = arith.subf %92, %104 : vector<32x32xf32>
    %cst_53 = arith.constant 9.99999974E-6 : f32
    %106 = vector.broadcast %cst_53 : f32 to vector<32x1xf32>
    %107 = arith.addf %103, %106 : vector<32x1xf32>
    %108 = math.rsqrt %107 : vector<32x1xf32>
    %109 = vector.broadcast %108 : vector<32x1xf32> to vector<32x32xf32>
    %110 = arith.mulf %105, %109 : vector<32x32xf32>
    %c0_54 = arith.constant 0 : index
    %c0_55 = arith.constant 0 : index
    %c0_56 = arith.constant 0 : index
    %111 = vector.load %arg13[%c0_54, %c0_55, %c0_56] : memref<2x1x32xf32, #tpu.memory_space<vmem>>, vector<1x1x32xf32>
    %112 = vector.shape_cast %111 : vector<1x1x32xf32> to vector<1x32xf32>
    %113 = vector.broadcast %112 : vector<1x32xf32> to vector<32x32xf32>
    %114 = arith.mulf %110, %113 : vector<32x32xf32>
    %c0_57 = arith.constant 0 : index
    %c0_58 = arith.constant 0 : index
    %c0_59 = arith.constant 0 : index
    %115 = vector.load %arg14[%c0_57, %c0_58, %c0_59] : memref<2x1x32xf32, #tpu.memory_space<vmem>>, vector<1x1x32xf32>
    %116 = vector.shape_cast %115 : vector<1x1x32xf32> to vector<1x32xf32>
    %117 = vector.broadcast %116 : vector<1x32xf32> to vector<32x32xf32>
    %118 = arith.addf %114, %117 : vector<32x32xf32>
    %c1 = arith.constant 1 : index
    %c0_60 = arith.constant 0 : index
    %c0_61 = arith.constant 0 : index
    %119 = vector.load %arg3[%c1, %c0_60, %c0_61] : memref<2x32x96xf32, #tpu.memory_space<vmem>>, vector<1x32x96xf32>
    %120 = vector.shape_cast %119 : vector<1x32x96xf32> to vector<32x96xf32>
    %cst_62 = arith.constant dense<0.000000e+00> : vector<32x96xf32>
    %121 = tpu.matmul %118, %120, %cst_62 {dimension_numbers = #tpu.dot_dimension_numbers<[1], [0], [0], [1], [0, 0, 1, 1], [], []>} : vector<32x32xf32>, vector<32x96xf32>, vector<32x96xf32> -> vector<32x96xf32>
    %c1_63 = arith.constant 1 : index
    %c0_64 = arith.constant 0 : index
    %c0_65 = arith.constant 0 : index
    %122 = vector.load %arg4[%c1_63, %c0_64, %c0_65] : memref<2x1x96xf32, #tpu.memory_space<vmem>>, vector<1x1x96xf32>
    %123 = vector.shape_cast %122 : vector<1x1x96xf32> to vector<1x96xf32>
    %124 = vector.broadcast %123 : vector<1x96xf32> to vector<32x96xf32>
    %125 = arith.addf %121, %124 : vector<32x96xf32>
    %126 = vector.shape_cast %125 : vector<32x96xf32> to vector<2x16x96xf32>
    %127 = tpu.transpose %126, [0, 2, 1] : vector<2x16x96xf32> -> vector<2x96x16xf32>
    %128 = vector.extract_strided_slice %127 {offsets = [0, 0, 0], sizes = [2, 32, 16], strides = [1, 1, 1]} : vector<2x96x16xf32> to vector<2x32x16xf32>
    %129 = vector.shape_cast %128 : vector<2x32x16xf32> to vector<8x8x16xf32>
    %130 = vector.extract_strided_slice %127 {offsets = [0, 32, 0], sizes = [2, 32, 16], strides = [1, 1, 1]} : vector<2x96x16xf32> to vector<2x32x16xf32>
    %131 = vector.shape_cast %130 : vector<2x32x16xf32> to vector<8x8x16xf32>
    %132 = vector.extract_strided_slice %127 {offsets = [0, 64, 0], sizes = [2, 32, 16], strides = [1, 1, 1]} : vector<2x96x16xf32> to vector<2x32x16xf32>
    %133 = vector.shape_cast %132 : vector<2x32x16xf32> to vector<8x8x16xf32>
    %134 = tpu.transpose %129, [0, 2, 1] : vector<8x8x16xf32> -> vector<8x16x8xf32>
    "tpu.trace_start"() <{level = 10 : i32, message = "bqd,bdk->bqk"}> : () -> ()
    %cst_66 = arith.constant dense<0.000000e+00> : vector<8x16x16xf32>
    %135 = tpu.matmul %134, %131, %cst_66 {dimension_numbers = #tpu.dot_dimension_numbers<[2], [1], [1], [2], [0, 0, 0, 1, 1, 2], [0], [0]>} : vector<8x16x8xf32>, vector<8x8x16xf32>, vector<8x16x16xf32> -> vector<8x16x16xf32>
    "tpu.trace_stop"() : () -> ()
    %cst_67 = arith.constant 0.353553385 : f32
    %136 = vector.broadcast %cst_67 : f32 to vector<8x16x16xf32>
    %137 = arith.mulf %135, %136 : vector<8x16x16xf32>
    %138 = vector.broadcast %4 : vector<8x1x16xf32> to vector<8x16x16xf32>
    %139 = arith.addf %137, %138 : vector<8x16x16xf32>
    %cst_68 = arith.constant dense<0xFF800000> : vector<8x16xf32>
    %140 = vector.multi_reduction <maximumf>, %139, %cst_68 [2] : vector<8x16x16xf32> to vector<8x16xf32>
    %141 = vector.shape_cast %140 : vector<8x16xf32> to vector<8x16x1xf32>
    %142 = vector.broadcast %141 : vector<8x16x1xf32> to vector<8x16x16xf32>
    %143 = arith.subf %139, %142 : vector<8x16x16xf32>
    %144 = math.exp %143 : vector<8x16x16xf32>
    %cst_69 = arith.constant dense<0.000000e+00> : vector<8x16xf32>
    %145 = vector.multi_reduction <add>, %144, %cst_69 [2] : vector<8x16x16xf32> to vector<8x16xf32>
    %146 = vector.shape_cast %145 : vector<8x16xf32> to vector<8x16x1xf32>
    %147 = tpu.reciprocal %146 {approx = true} : vector<8x16x1xf32> -> vector<8x16x1xf32>
    %148 = vector.broadcast %147 : vector<8x16x1xf32> to vector<8x16x16xf32>
    %149 = arith.mulf %144, %148 : vector<8x16x16xf32>
    "tpu.trace_start"() <{level = 10 : i32, message = "bdk,bqk->bdq"}> : () -> ()
    %cst_70 = arith.constant dense<0.000000e+00> : vector<8x8x16xf32>
    %150 = tpu.matmul %133, %149, %cst_70 {dimension_numbers = #tpu.dot_dimension_numbers<[2], [2], [1], [1], [0, 0, 0, 1, 1, 1], [0], [0]>} : vector<8x8x16xf32>, vector<8x16x16xf32>, vector<8x8x16xf32> -> vector<8x8x16xf32>
    "tpu.trace_stop"() : () -> ()
    %151 = vector.shape_cast %150 : vector<8x8x16xf32> to vector<2x32x16xf32>
    %152 = tpu.transpose %151, [0, 2, 1] : vector<2x32x16xf32> -> vector<2x16x32xf32>
    %153 = vector.shape_cast %152 : vector<2x16x32xf32> to vector<32x32xf32>
    %c1_71 = arith.constant 1 : index
    %c0_72 = arith.constant 0 : index
    %c0_73 = arith.constant 0 : index
    %154 = vector.load %arg5[%c1_71, %c0_72, %c0_73] : memref<2x32x32xf32, #tpu.memory_space<vmem>>, vector<1x32x32xf32>
    %155 = vector.shape_cast %154 : vector<1x32x32xf32> to vector<32x32xf32>
    %cst_74 = arith.constant dense<0.000000e+00> : vector<32x32xf32>
    %156 = tpu.matmul %153, %155, %cst_74 {dimension_numbers = #tpu.dot_dimension_numbers<[1], [0], [0], [1], [0, 0, 1, 1], [], []>} : vector<32x32xf32>, vector<32x32xf32>, vector<32x32xf32> -> vector<32x32xf32>
    %c1_75 = arith.constant 1 : index
    %c0_76 = arith.constant 0 : index
    %c0_77 = arith.constant 0 : index
    %157 = vector.load %arg6[%c1_75, %c0_76, %c0_77] : memref<2x1x32xf32, #tpu.memory_space<vmem>>, vector<1x1x32xf32>
    %158 = vector.shape_cast %157 : vector<1x1x32xf32> to vector<1x32xf32>
    %159 = vector.broadcast %158 : vector<1x32xf32> to vector<32x32xf32>
    %160 = arith.addf %156, %159 : vector<32x32xf32>
    %161 = arith.addf %118, %160 : vector<32x32xf32>
    %cst_78 = arith.constant dense<0.000000e+00> : vector<32xf32>
    %162 = vector.multi_reduction <add>, %161, %cst_78 [1] : vector<32x32xf32> to vector<32xf32>
    %163 = vector.shape_cast %162 : vector<32xf32> to vector<32x1xf32>
    %cst_79 = arith.constant 3.200000e+01 : f32
    %164 = vector.broadcast %cst_79 : f32 to vector<32x1xf32>
    %165 = arith.divf %163, %164 : vector<32x1xf32>
    %166 = vector.broadcast %165 : vector<32x1xf32> to vector<32x32xf32>
    %167 = arith.subf %161, %166 : vector<32x32xf32>
    %168 = arith.mulf %167, %167 : vector<32x32xf32>
    %cst_80 = arith.constant dense<0.000000e+00> : vector<32xf32>
    %169 = vector.multi_reduction <add>, %168, %cst_80 [1] : vector<32x32xf32> to vector<32xf32>
    %170 = vector.shape_cast %169 : vector<32xf32> to vector<32x1xf32>
    %cst_81 = arith.constant 3.200000e+01 : f32
    %171 = vector.broadcast %cst_81 : f32 to vector<32x1xf32>
    %172 = arith.divf %170, %171 : vector<32x1xf32>
    %173 = vector.broadcast %165 : vector<32x1xf32> to vector<32x32xf32>
    %174 = arith.subf %161, %173 : vector<32x32xf32>
    %cst_82 = arith.constant 9.99999974E-6 : f32
    %175 = vector.broadcast %cst_82 : f32 to vector<32x1xf32>
    %176 = arith.addf %172, %175 : vector<32x1xf32>
    %177 = math.rsqrt %176 : vector<32x1xf32>
    %178 = vector.broadcast %177 : vector<32x1xf32> to vector<32x32xf32>
    %179 = arith.mulf %174, %178 : vector<32x32xf32>
    %c1_83 = arith.constant 1 : index
    %c0_84 = arith.constant 0 : index
    %c0_85 = arith.constant 0 : index
    %180 = vector.load %arg7[%c1_83, %c0_84, %c0_85] : memref<2x1x32xf32, #tpu.memory_space<vmem>>, vector<1x1x32xf32>
    %181 = vector.shape_cast %180 : vector<1x1x32xf32> to vector<1x32xf32>
    %182 = vector.broadcast %181 : vector<1x32xf32> to vector<32x32xf32>
    %183 = arith.mulf %179, %182 : vector<32x32xf32>
    %c1_86 = arith.constant 1 : index
    %c0_87 = arith.constant 0 : index
    %c0_88 = arith.constant 0 : index
    %184 = vector.load %arg8[%c1_86, %c0_87, %c0_88] : memref<2x1x32xf32, #tpu.memory_space<vmem>>, vector<1x1x32xf32>
    %185 = vector.shape_cast %184 : vector<1x1x32xf32> to vector<1x32xf32>
    %186 = vector.broadcast %185 : vector<1x32xf32> to vector<32x32xf32>
    %187 = arith.addf %183, %186 : vector<32x32xf32>
    %c1_89 = arith.constant 1 : index
    %c0_90 = arith.constant 0 : index
    %c0_91 = arith.constant 0 : index
    %188 = vector.load %arg9[%c1_89, %c0_90, %c0_91] : memref<2x32x64xf32, #tpu.memory_space<vmem>>, vector<1x32x64xf32>
    %189 = vector.shape_cast %188 : vector<1x32x64xf32> to vector<32x64xf32>
    %cst_92 = arith.constant dense<0.000000e+00> : vector<32x64xf32>
    %190 = tpu.matmul %187, %189, %cst_92 {dimension_numbers = #tpu.dot_dimension_numbers<[1], [0], [0], [1], [0, 0, 1, 1], [], []>} : vector<32x32xf32>, vector<32x64xf32>, vector<32x64xf32> -> vector<32x64xf32>
    %c1_93 = arith.constant 1 : index
    %c0_94 = arith.constant 0 : index
    %c0_95 = arith.constant 0 : index
    %191 = vector.load %arg10[%c1_93, %c0_94, %c0_95] : memref<2x1x64xf32, #tpu.memory_space<vmem>>, vector<1x1x64xf32>
    %192 = vector.shape_cast %191 : vector<1x1x64xf32> to vector<1x64xf32>
    %193 = vector.broadcast %192 : vector<1x64xf32> to vector<32x64xf32>
    %194 = arith.addf %190, %193 : vector<32x64xf32>
    %cst_96 = arith.constant 0.000000e+00 : f32
    %195 = vector.broadcast %cst_96 : f32 to vector<32x64xf32>
    %196 = arith.maximumf %194, %195 : vector<32x64xf32>
    %c1_97 = arith.constant 1 : index
    %c0_98 = arith.constant 0 : index
    %c0_99 = arith.constant 0 : index
    %197 = vector.load %arg11[%c1_97, %c0_98, %c0_99] : memref<2x64x32xf32, #tpu.memory_space<vmem>>, vector<1x64x32xf32>
    %198 = vector.shape_cast %197 : vector<1x64x32xf32> to vector<64x32xf32>
    %cst_100 = arith.constant dense<0.000000e+00> : vector<32x32xf32>
    %199 = tpu.matmul %196, %198, %cst_100 {dimension_numbers = #tpu.dot_dimension_numbers<[1], [0], [0], [1], [0, 0, 1, 1], [], []>} : vector<32x64xf32>, vector<64x32xf32>, vector<32x32xf32> -> vector<32x32xf32>
    %c1_101 = arith.constant 1 : index
    %c0_102 = arith.constant 0 : index
    %c0_103 = arith.constant 0 : index
    %200 = vector.load %arg12[%c1_101, %c0_102, %c0_103] : memref<2x1x32xf32, #tpu.memory_space<vmem>>, vector<1x1x32xf32>
    %201 = vector.shape_cast %200 : vector<1x1x32xf32> to vector<1x32xf32>
    %202 = vector.broadcast %201 : vector<1x32xf32> to vector<32x32xf32>
    %203 = arith.addf %199, %202 : vector<32x32xf32>
    %204 = arith.addf %187, %203 : vector<32x32xf32>
    %cst_104 = arith.constant dense<0.000000e+00> : vector<32xf32>
    %205 = vector.multi_reduction <add>, %204, %cst_104 [1] : vector<32x32xf32> to vector<32xf32>
    %206 = vector.shape_cast %205 : vector<32xf32> to vector<32x1xf32>
    %cst_105 = arith.constant 3.200000e+01 : f32
    %207 = vector.broadcast %cst_105 : f32 to vector<32x1xf32>
    %208 = arith.divf %206, %207 : vector<32x1xf32>
    %209 = vector.broadcast %208 : vector<32x1xf32> to vector<32x32xf32>
    %210 = arith.subf %204, %209 : vector<32x32xf32>
    %211 = arith.mulf %210, %210 : vector<32x32xf32>
    %cst_106 = arith.constant dense<0.000000e+00> : vector<32xf32>
    %212 = vector.multi_reduction <add>, %211, %cst_106 [1] : vector<32x32xf32> to vector<32xf32>
    %213 = vector.shape_cast %212 : vector<32xf32> to vector<32x1xf32>
    %cst_107 = arith.constant 3.200000e+01 : f32
    %214 = vector.broadcast %cst_107 : f32 to vector<32x1xf32>
    %215 = arith.divf %213, %214 : vector<32x1xf32>
    %216 = vector.broadcast %208 : vector<32x1xf32> to vector<32x32xf32>
    %217 = arith.subf %204, %216 : vector<32x32xf32>
    %cst_108 = arith.constant 9.99999974E-6 : f32
    %218 = vector.broadcast %cst_108 : f32 to vector<32x1xf32>
    %219 = arith.addf %215, %218 : vector<32x1xf32>
    %220 = math.rsqrt %219 : vector<32x1xf32>
    %221 = vector.broadcast %220 : vector<32x1xf32> to vector<32x32xf32>
    %222 = arith.mulf %217, %221 : vector<32x32xf32>
    %c1_109 = arith.constant 1 : index
    %c0_110 = arith.constant 0 : index
    %c0_111 = arith.constant 0 : index
    %223 = vector.load %arg13[%c1_109, %c0_110, %c0_111] : memref<2x1x32xf32, #tpu.memory_space<vmem>>, vector<1x1x32xf32>
    %224 = vector.shape_cast %223 : vector<1x1x32xf32> to vector<1x32xf32>
    %225 = vector.broadcast %224 : vector<1x32xf32> to vector<32x32xf32>
    %226 = arith.mulf %222, %225 : vector<32x32xf32>
    %c1_112 = arith.constant 1 : index
    %c0_113 = arith.constant 0 : index
    %c0_114 = arith.constant 0 : index
    %227 = vector.load %arg14[%c1_112, %c0_113, %c0_114] : memref<2x1x32xf32, #tpu.memory_space<vmem>>, vector<1x1x32xf32>
    %228 = vector.shape_cast %227 : vector<1x1x32xf32> to vector<1x32xf32>
    %229 = vector.broadcast %228 : vector<1x32xf32> to vector<32x32xf32>
    %230 = arith.addf %226, %229 : vector<32x32xf32>
    %231 = vector.shape_cast %230 : vector<32x32xf32> to vector<2x16x32xf32>
    %c0_115 = arith.constant 0 : index
    %c0_116 = arith.constant 0 : index
    %c0_117 = arith.constant 0 : index
    %232 = vector.load %arg15[%c0_115, %c0_116, %c0_117] : memref<2x16x32xf32, #tpu.memory_space<vmem>>, vector<2x16x32xf32>
    tpu.vector_store %arg15[%c0_115, %c0_116, %c0_117], %231 {strides = array<i32>} : memref<2x16x32xf32, #tpu.memory_space<vmem>>, vector<2x16x32xf32>,
    return
  }
  func.func @transform_0(%arg0: i32) -> (i32, i32, i32) {
    %c0_i32 = arith.constant 0 : i32
    %c0_i32_0 = arith.constant 0 : i32
    %c0_i32_1 = arith.constant 0 : i32
    return %arg0, %c0_i32, %c0_i32_0 : i32, i32, i32
  }
  func.func @transform_1(%arg0: i32) -> (i32, i32, i32) {
    %c0_i32 = arith.constant 0 : i32
    %c0_i32_0 = arith.constant 0 : i32
    %c0_i32_1 = arith.constant 0 : i32
    return %arg0, %c0_i32, %c0_i32_0 : i32, i32, i32
  }
  func.func @transform_2(%arg0: i32) -> (i32, i32, i32) {
    %c0_i32 = arith.constant 0 : i32
    %c0_i32_0 = arith.constant 0 : i32
    %c0_i32_1 = arith.constant 0 : i32
    %c0_i32_2 = arith.constant 0 : i32
    return %c0_i32, %c0_i32_0, %c0_i32_1 : i32, i32, i32
  }
  func.func @transform_3(%arg0: i32) -> (i32, i32, i32) {
    %c0_i32 = arith.constant 0 : i32
    %c0_i32_0 = arith.constant 0 : i32
    %c0_i32_1 = arith.constant 0 : i32
    %c0_i32_2 = arith.constant 0 : i32
    return %c0_i32, %c0_i32_0, %c0_i32_1 : i32, i32, i32
  }
  func.func @transform_4(%arg0: i32) -> (i32, i32, i32) {
    %c0_i32 = arith.constant 0 : i32
    %c0_i32_0 = arith.constant 0 : i32
    %c0_i32_1 = arith.constant 0 : i32
    %c0_i32_2 = arith.constant 0 : i32
    return %c0_i32, %c0_i32_0, %c0_i32_1 : i32, i32, i32
  }
  func.func @transform_5(%arg0: i32) -> (i32, i32, i32) {
    %c0_i32 = arith.constant 0 : i32
    %c0_i32_0 = arith.constant 0 : i32
    %c0_i32_1 = arith.constant 0 : i32
    %c0_i32_2 = arith.constant 0 : i32
    return %c0_i32, %c0_i32_0, %c0_i32_1 : i32, i32, i32
  }
  func.func @transform_6(%arg0: i32) -> (i32, i32, i32) {
    %c0_i32 = arith.constant 0 : i32
    %c0_i32_0 = arith.constant 0 : i32
    %c0_i32_1 = arith.constant 0 : i32
    %c0_i32_2 = arith.constant 0 : i32
    return %c0_i32, %c0_i32_0, %c0_i32_1 : i32, i32, i32
  }
  func.func @transform_7(%arg0: i32) -> (i32, i32, i32) {
    %c0_i32 = arith.constant 0 : i32
    %c0_i32_0 = arith.constant 0 : i32
    %c0_i32_1 = arith.constant 0 : i32
    %c0_i32_2 = arith.constant 0 : i32
    return %c0_i32, %c0_i32_0, %c0_i32_1 : i32, i32, i32
  }
  func.func @transform_8(%arg0: i32) -> (i32, i32, i32) {
    %c0_i32 = arith.constant 0 : i32
    %c0_i32_0 = arith.constant 0 : i32
    %c0_i32_1 = arith.constant 0 : i32
    %c0_i32_2 = arith.constant 0 : i32
    return %c0_i32, %c0_i32_0, %c0_i32_1 : i32, i32, i32
  }
  func.func @transform_9(%arg0: i32) -> (i32, i32, i32) {
    %c0_i32 = arith.constant 0 : i32
    %c0_i32_0 = arith.constant 0 : i32
    %c0_i32_1 = arith.constant 0 : i32
    %c0_i32_2 = arith.constant 0 : i32
    return %c0_i32, %c0_i32_0, %c0_i32_1 : i32, i32, i32
  }
  func.func @transform_10(%arg0: i32) -> (i32, i32, i32) {
    %c0_i32 = arith.constant 0 : i32
    %c0_i32_0 = arith.constant 0 : i32
    %c0_i32_1 = arith.constant 0 : i32
    %c0_i32_2 = arith.constant 0 : i32
    return %c0_i32, %c0_i32_0, %c0_i32_1 : i32, i32, i32
  }
  func.func @transform_11(%arg0: i32) -> (i32, i32, i32) {
    %c0_i32 = arith.constant 0 : i32
    %c0_i32_0 = arith.constant 0 : i32
    %c0_i32_1 = arith.constant 0 : i32
    %c0_i32_2 = arith.constant 0 : i32
    return %c0_i32, %c0_i32_0, %c0_i32_1 : i32, i32, i32
  }
  func.func @transform_12(%arg0: i32) -> (i32, i32, i32) {
    %c0_i32 = arith.constant 0 : i32
    %c0_i32_0 = arith.constant 0 : i32
    %c0_i32_1 = arith.constant 0 : i32
    %c0_i32_2 = arith.constant 0 : i32
    return %c0_i32, %c0_i32_0, %c0_i32_1 : i32, i32, i32
  }
  func.func @transform_13(%arg0: i32) -> (i32, i32, i32) {
    %c0_i32 = arith.constant 0 : i32
    %c0_i32_0 = arith.constant 0 : i32
    %c0_i32_1 = arith.constant 0 : i32
    %c0_i32_2 = arith.constant 0 : i32
    return %c0_i32, %c0_i32_0, %c0_i32_1 : i32, i32, i32
  }
  func.func @transform_14(%arg0: i32) -> (i32, i32, i32) {
    %c0_i32 = arith.constant 0 : i32
    %c0_i32_0 = arith.constant 0 : i32
    %c0_i32_1 = arith.constant 0 : i32
    return %arg0, %c0_i32, %c0_i32_0 : i32, i32, i32
  }
}

</mosaic_0001>

<bundles_post_ra>
// kernel: tpu_custom_call.1
= control target key start
LH: loop header
LB: loop body
LE: loop exit
PB: predicated region body
PF: predicated region fallthrough
CT: control target
= control target key end

     0   :  { %19 = vsyncpa [#allocation3], 0  ;;  %s4552_s0 = inlined_call_operand.hbm [shape: f32[2,16,32], index: 0, kind: input, shape index: {}]   ;;  %s4553_s1 = inlined_call_operand.hbm [shape: f32[2,1,16], index: 1, kind: input, shape index: {}]   ;;  %s4554_s2 = inlined_call_operand.vmem [shape: f32[2,32,96], index: 2, kind: input, shape index: {}]   ;;  %s4555_s3 = inlined_call_operand.vmem [shape: f32[2,1,96], index: 3, kind: input, shape index: {}]   ;;  %s4556_s4 = inlined_call_operand.vmem [shape: f32[2,32,32], index: 4, kind: input, shape index: {}]   ;;  %s4557_s5 = inlined_call_operand.hbm [shape: f32[2,1,32], index: 5, kind: input, shape index: {}]   ;;  %s4558_s6 = inlined_call_operand.vmem [shape: f32[2,1,32], index: 6, kind: input, shape index: {}]   ;;  %s4559_s7 = inlined_call_operand.hbm [shape: f32[2,1,32], index: 7, kind: input, shape index: {}]   ;;  %s4560_s8 = inlined_call_operand.vmem [shape: f32[2,32,64], index: 8, kind: input, shape index: {}]   ;;  %s4561_s9 = inlined_call_operand.vmem [shape: f32[2,1,64], index: 9, kind: input, shape index: {}]   ;;  %s4562_s10 = inlined_call_operand.vmem [shape: f32[2,64,32], index: 10, kind: input, shape index: {}]   ;;  %s4563_s11 = inlined_call_operand.vmem [shape: f32[2,1,32], index: 11, kind: input, shape index: {}]   ;;  %s4564_s12 = inlined_call_operand.vmem [shape: f32[2,1,32], index: 12, kind: input, shape index: {}]   ;;  %s4565_s13 = inlined_call_operand.hbm [shape: f32[2,1,32], index: 13, kind: input, shape index: {}]   ;;  %s4566_s14 = inlined_call_operand.hbm [shape: f32[2,16,32], index: 14, kind: output, shape index: {}]  }
   0x1   :  { %20 = vsyncpa [#allocation6], 0 }
   0x2   :  { %21 = vsyncpa [#allocation9], 0  ;;  %s40_s15 = sshll.u32 %s4553_s1, 4  ;;  %s41_s15 = int_to_ptr.hbm [resolvable:$true] %s40_s15 }
   0x3   :  { %22 = vsyncpa [#allocation4], 0  ;;  %s3625_s16 = smov [#allocation5]   ;;  %s74_s20 = sshll.u32 %s4559_s7, 4  ;;  %s75_s20 = int_to_ptr.hbm [resolvable:$true] %s74_s20 }
   0x4   :  { %s42_s17 = sshll.u32 %s3625_s16, 4  ;;  %s3626_s21 = smov 16   ;;  %s43_s17 = int_to_ptr.vmem [resolvable:$true] %s42_s17 }
   0x5   :  { %s3627_s22 = smov 1   ;;  %s3628_s23 = smov [#allocation8]  }
   0x6   :  { %48 = dma.hbm_to_vmem [thread:$0]  %s41_s15, 32, %s43_s17, [#allocation6], %s3626_s21, %s3626_s21, %s3627_s22  }
   0x7   :  { %s76_s24 = sshll.u32 %s3628_s23, 4  ;;  %s27_s26 = sshll.u32 %s4552_s0, 4  ;;  %s77_s24 = int_to_ptr.vmem [resolvable:$true] %s76_s24  ;;  %s28_s26 = int_to_ptr.hbm [resolvable:$true] %s27_s26 }
   0x8   :  { %82 = dma.hbm_to_vmem [thread:$0]  %s75_s20, 32, %s77_s24, [#allocation9], %s3626_s21, %s3626_s21, %s3627_s22  }
   0x9   :  { %s3629_s7 = smov [#allocation2]   ;;  %s59_s30 = sshll.u32 %s4557_s5, 4  ;;  %s60_s30 = int_to_ptr.hbm [resolvable:$true] %s59_s30 }
   0xa   :  { %s29_s27 = sshll.u32 %s3629_s7, 4  ;;  %s3630_s15 = smov 128   ;;  %s30_s27 = int_to_ptr.vmem [resolvable:$true] %s29_s27 }
   0xb   :  { %s3631_s16 = smov 8   ;;  %s3632_s0 = smov [#allocation7]  }
   0xc   :  { %35 = dma.hbm_to_vmem [thread:$0]  %s28_s26, 512, %s30_s27, [#allocation3], %s3630_s15, %s3630_s15, %s3631_s16  }
   0xd   :  { %s61_s17 = sshll.u32 %s3632_s0, 4  ;;  %s97_s20 = sshll.u32 %s4565_s13, 4  ;;  %s62_s17 = int_to_ptr.vmem [resolvable:$true] %s61_s17  ;;  %s98_s20 = int_to_ptr.hbm [resolvable:$true] %s97_s20 }
   0xe   :  { %67 = dma.hbm_to_vmem [thread:$0]  %s60_s30, 32, %s62_s17, [#allocation6], %s3626_s21, %s3626_s21, %s3627_s22  }
   0xf   :  { %s3633_s5 = smov [#allocation10]  }
  0x10   :  { %s99_s23 = sshll.u32 %s3633_s5, 4  ;;  %s100_s23 = int_to_ptr.vmem [resolvable:$true] %s99_s23 }
  0x11   :  { %105 = dma.hbm_to_vmem [thread:$0]  %s98_s20, 32, %s100_s23, [#allocation9], %s3626_s21, %s3626_s21, %s3627_s22  }
  0x12   :  { %3617 = dma.done.wait [#allocation3], 512  }
  0x13   :  { %3618 = vsyncadd [#allocation3], 4294966784 }
  0x14   :  { %3619 = dma.done.wait [#allocation6], 64  }
  0x15   :  { %3620 = vsyncadd [#allocation6], 4294967232 }
  0x16   :  { %3621 = dma.done.wait [#allocation9], 64  }
  0x17   :  { %3622 = vsyncadd [#allocation9], 4294967232  ;;  %v135_v0 = vld [vmem:[%s4554_s2 + $0x18] sm:$0xff]  ;;  %v134_v1 = vld [vmem:[%s4554_s2 + $0x10] sm:$0xff]  ;;  %vm140_vm0 = vcmask 261120   ;;  %vm502_vm1 = vcmask 64512  }
  0x18   :  { %165 = vmatpush.msra.mxu0 %v135_v0  ;;  %v133_v2 = vld [vmem:[%s4554_s2 + $0x8] sm:$0xff]  ;;  %v132_v3 = vld [vmem:[%s4554_s2] sm:$0xff]  ;;  %v3761_v6 = vld [vmem:[#allocation2 + $0x10] sm:$0xff]  ;;  %vm773_vm2 = vcmask 130048  }
  0x19   :  { %v3753_v4 = vld [vmem:[#allocation2] sm:$0xff]  ;;  %v3757_v5 = vld [vmem:[#allocation2 + $0x8] sm:$0xff]  ;;  %v3765_v7 = vld [vmem:[#allocation2 + $0x18] sm:$0xff] }
  0x1a   :  { %166 = vmatpush.msra.mxu0 %v134_v1  ;;  %v3291_v8 = vld [vmem:[%s4555_s3] ss:$0 sm:$0xff] }
  0x1b   :  { %v3292_v45 = vld [vmem:[#allocation5] ss:$0 sm:$0xff] }
  0x1c   :  { %167 = vmatpush.msra.mxu0 %v133_v2 }
  0x1e   :  { %168 = vmatpush.msra.mxu0 %v132_v3 }
  0x1f   :  { %3138 = vmatmul.msk.f32.vlgmr.msra.gmra.mxu0 %vm140_vm0, %v3753_v4 }
  0x27   :  { %3139 = vmatmul.msk.f32.gmra.mxu0 %vm140_vm0, %v3757_v5 }
  0x2f   :  { %3140 = vmatmul.msk.f32.gmra.mxu0 %vm140_vm0, %v3761_v6 }
  0x37   :  { %3141 = vmatmul.msk.f32.gmra.mxu0 %vm140_vm0, %v3765_v7 }
  0x9c   :  { %v170_v9 = vpop.f32.mrf.mxu0 }
  0x9d   :  { %v171_v10 = vadd.f32 %v3291_v8, %v170_v9 }
  0x9f   :  { %182 = vxpose.xlu0.b32.start [1/2] (short) (narrow) %v171_v10, 96 }
  0xa4   :  { %v173_v11 = vpop.f32.mrf.mxu0 }
  0xa5   :  { %v174_v12 = vadd.f32 %v3291_v8, %v173_v11 }
  0xa7   :  { %183 = vxpose.xlu0.b32.end [2/2] (short) (narrow) %v174_v12, 96 }
  0xac   :  { %v176_v14 = vpop.f32.mrf.mxu0 }
  0xad   :  { %v177_v16 = vadd.f32 %v3291_v8, %v176_v14 }
  0xb4   :  { %v179_v18 = vpop.f32.mrf.mxu0 }
  0xb5   :  { %v180_v19 = vadd.f32 %v3291_v8, %v179_v18 }
 0x143   :  { %v198_v13 = vpop.trf.xlu0 }
 0x144   :  { %246 = vxpose.xlu1.b32.start.end [1/1] (short) (narrow) %v198_v13, 16 }
 0x14b   :  { %v199_v15 = vpop.trf.xlu0 }
 0x14c   :  { %278 = vxpose.xlu2.b32.start.end [1/1] (short) (narrow) %v199_v15, 16 }
 0x153   :  { %v200_v17 = vpop.trf.xlu0 }
 0x154   :  { %214 = vxpose.xlu1.b32.start [1/2] (short) (narrow) %v177_v16, 96 }
 0x15b   :  { %v201_v20 = vpop.trf.xlu0 }
 0x15c   :  { %215 = vxpose.xlu1.b32.end [2/2] (short) (narrow) %v180_v19, 96  ;;  %310 = vxpose.xlu2.b32.start.end [1/1] (short) (narrow) %v200_v17, 16 }
 0x15d   :  { %342 = vxpose.xlu0.b32.start.end [1/1] (short) (narrow) %v201_v20, 16 }
 0x163   :  { %v202_v21 = vpop.trf.xlu0 }
 0x164   :  { %524 = vmatpush.msra.mxu1 %v202_v21 }
 0x16b   :  { %v203_v22 = vpop.trf.xlu0 }
 0x16c   :  { %553 = vmatpush.msra.mxu2 %v203_v22 }
 0x173   :  { %v204_v23 = vpop.trf.xlu0 }
 0x174   :  { %582 = vmatpush.msra.mxu3 %v204_v23 }
 0x17b   :  { %v205_v24 = vpop.trf.xlu0 }
 0x17c   :  { %611 = vmatpush.msrb.mxu1 %v205_v24 }
 0x183   :  { %v3772_v25 = vpop.trf.xlu0 }
 0x18b   :  { %v3774_v26 = vpop.trf.xlu0 }
 0x193   :  { %v3778_v30 = vpop.trf.xlu0 }
 0x19b   :  { %v3783_v33 = vpop.trf.xlu0 }
 0x1e5   :  { %v294_v27 = vpop.trf.xlu2 }
 0x1e6   :  { %3144 = vmatmul.msk.f32.vlgmr.msra.gmra.mxu2 %vm502_vm1, %v294_v27 }
 0x1e8   :  { %v262_v28 = vpop.trf.xlu1 }
 0x1e9   :  { %3142 = vmatmul.msk.f32.vlgmr.msra.gmra.mxu1 %vm502_vm1, %v262_v28 }
 0x1ed   :  { %v295_v29 = vpop.trf.xlu2 }
 0x1ee   :  { %3145 = vmatmul.msk.f32.gmra.mxu2 %vm502_vm1, %v295_v29 }
 0x1f0   :  { %v263_v31 = vpop.trf.xlu1 }
 0x1f1   :  { %3143 = vmatmul.msk.f32.gmra.mxu1 %vm502_vm1, %v263_v31 }
 0x1f5   :  { %v326_v32 = vpop.trf.xlu2 }
 0x1f6   :  { %3146 = vmatmul.msk.f32.vlgmr.msra.gmra.mxu3 %vm502_vm1, %v326_v32 }
 0x1f8   :  { %v230_v34 = vpop.trf.xlu1 }
 0x1f9   :  { %374 = vxpose.xlu2.b32.start.end [1/1] (short) (narrow) %v230_v34, 16 }
 0x1fd   :  { %v327_v35 = vpop.trf.xlu2 }
 0x1fe   :  { %3147 = vmatmul.msk.f32.gmra.mxu3 %vm502_vm1, %v327_v35 }
 0x200   :  { %v231_v36 = vpop.trf.xlu1 }
 0x201   :  { %406 = vxpose.xlu1.b32.start.end [1/1] (short) (narrow) %v231_v36, 16  ;;  %v358_v37 = vpop.trf.xlu0 }
 0x202   :  { %3148 = vmatmul.msk.f32.vlgmr.msrb.gmra.mxu1 %vm502_vm1, %v358_v37  ;;  %v3293_v37 = vld [vmem:[#allocation5 + $0x1] ss:$0 sm:$0xff] }
 0x208   :  { %v232_v38 = vpop.trf.xlu1 }
 0x209   :  { %438 = vxpose.xlu2.b32.start.end [1/1] (short) (narrow) %v232_v38, 16  ;;  %v359_v39 = vpop.trf.xlu0 }
 0x20a   :  { %3149 = vmatmul.msk.f32.gmra.mxu1 %vm502_vm1, %v359_v39 }
 0x210   :  { %v233_v40 = vpop.trf.xlu1 }
 0x218   :  { %v234_v41 = vpop.trf.xlu1 }
 0x219   :  { %470 = vxpose.xlu2.b32.start.end [1/1] (short) (narrow) %v233_v40, 16  ;;  %640 = vmatpush.msrb.mxu2 %v234_v41 }
 0x220   :  { %v235_v42 = vpop.trf.xlu1 }
 0x221   :  { %669 = vmatpush.msrb.mxu3 %v235_v42 }
 0x228   :  { %v236_v43 = vpop.trf.xlu1 }
 0x229   :  { %698 = vmatpush.msra.mxu1 %v236_v43 }
 0x230   :  { %v237_v44 = vpop.trf.xlu1 }
 0x231   :  { %727 = vmatpush.msra.mxu2 %v237_v44 }
 0x238   :  { %v3792_v52 = vpop.trf.xlu1 }
 0x240   :  { %v3798_v59 = vpop.trf.xlu1 }
 0x248   :  { %v3808_v3 = vpop.trf.xlu1 }
 0x250   :  { %v3816_v14 = vpop.trf.xlu1 }
 0x266   :  { %v526_v46 = vpop.f32.mrf.mxu1 }
 0x267   :  { %v735_v47 = vmul.f32 0.35355338, %v526_v46 }
 0x269   :  { %v3788_v48 = vadd.f32 %v3292_v45, %v735_v47  ;;  %v555_v62 = vpop.f32.mrf.mxu2 }
 0x26a   :  { %v737_v1 = vmul.f32 0.35355338, %v555_v62 }
 0x26b   :  { %v774_v49 = vsel %vm773_vm2, %v3788_v48, -inf }
 0x26c   :  { %775 = vmax.xlane.f32.xlu0 %v774_v49  ;;  %v3811_v9 = vadd.f32 %v3292_v45, %v737_v1 }
 0x26e   :  { %v529_v50 = vpop.f32.mrf.mxu1  ;;  %v780_v11 = vsel %vm773_vm2, %v3811_v9, -inf }
 0x26f   :  { %v736_v61 = vmul.f32 0.35355338, %v529_v50 }
 0x271   :  { %v3804_v0 = vadd.f32 %v3292_v45, %v736_v61  ;;  %v558_v10 = vpop.f32.mrf.mxu2 }
 0x272   :  { %v738_v12 = vmul.f32 0.35355338, %v558_v10 }
 0x273   :  { %v777_v2 = vsel %vm773_vm2, %v3804_v0, -inf }
 0x274   :  { %v3818_v15 = vadd.f32 %v3292_v45, %v738_v12 }
 0x276   :  { %v783_v17 = vsel %vm773_vm2, %v3818_v15, -inf }
 0x279   :  { %v584_v51 = vpop.f32.mrf.mxu3 }
 0x27a   :  { %v739_v16 = vmul.f32 0.35355338, %v584_v51 }
 0x27c   :  { %v3823_v19 = vadd.f32 %v3292_v45, %v739_v16 }
 0x27e   :  { %v786_v22 = vsel %vm773_vm2, %v3823_v19, -inf }
 0x27f   :  { %v613_v54 = vpop.f32.mrf.mxu1 }
 0x280   :  { %v741_v57 = vmul.f32 0.35355338, %v613_v54 }
 0x281   :  { %v587_v53 = vpop.f32.mrf.mxu3 }
 0x282   :  { %v740_v55 = vmul.f32 0.35355338, %v587_v53  ;;  %v3800_v60 = vadd.f32 %v3292_v45, %v741_v57 }
 0x284   :  { %v3794_v56 = vadd.f32 %v3292_v45, %v740_v55  ;;  %v792_v63 = vsel %vm773_vm2, %v3800_v60, -inf }
 0x286   :  { %v789_v58 = vsel %vm773_vm2, %v3794_v56, -inf }
 0x287   :  { %790 = vmax.xlane.f32.xlu1 %v789_v58  ;;  %v616_v20 = vpop.f32.mrf.mxu1 }
 0x288   :  { %v742_v23 = vmul.f32 0.35355338, %v616_v20 }
 0x28a   :  { %v3829_v27 = vadd.f32 %v3292_v45, %v742_v23 }
 0x28c   :  { %v795_v29 = vsel %vm773_vm2, %v3829_v27, -inf }
 0x28f   :  { %793 = vmax.xlane.f32.xlu1 %v792_v63 }
 0x292   :  { %v390_v8 = vpop.trf.xlu2  ;;  %778 = vmax.xlane.f32.xlu2 %v777_v2 }
 0x293   :  { %3150 = vmatmul.msk.f32.vlgmr.msrb.gmra.mxu2 %vm502_vm1, %v390_v8 }
 0x29a   :  { %v391_v13 = vpop.trf.xlu2  ;;  %781 = vmax.xlane.f32.xlu2 %v780_v11 }
 0x29b   :  { %3151 = vmatmul.msk.f32.gmra.mxu2 %vm502_vm1, %v391_v13 }
 0x2a2   :  { %v454_v18 = vpop.trf.xlu2  ;;  %784 = vmax.xlane.f32.xlu2 %v783_v17 }
 0x2a3   :  { %3154 = vmatmul.msk.f32.vlgmr.msra.gmra.mxu1 %vm502_vm1, %v454_v18 }
 0x2a5   :  { %v422_v21 = vpop.trf.xlu1 }
 0x2a6   :  { %3152 = vmatmul.msk.f32.vlgmr.msrb.gmra.mxu3 %vm502_vm1, %v422_v21 }
 0x2aa   :  { %v455_v24 = vpop.trf.xlu2  ;;  %787 = vmax.xlane.f32.xlu2 %v786_v22 }
 0x2ab   :  { %3155 = vmatmul.msk.f32.gmra.mxu1 %vm502_vm1, %v455_v24 }
 0x2ad   :  { %v423_v28 = vpop.trf.xlu1 }
 0x2ae   :  { %3153 = vmatmul.msk.f32.gmra.mxu3 %vm502_vm1, %v423_v28 }
 0x2b2   :  { %v486_v31 = vpop.trf.xlu2  ;;  %796 = vmax.xlane.f32.xlu2 %v795_v29 }
 0x2b3   :  { %3156 = vmatmul.msk.f32.vlgmr.msra.gmra.mxu2 %vm502_vm1, %v486_v31 }
 0x2ba   :  { %v487_v32 = vpop.trf.xlu2 }
 0x2bb   :  { %3157 = vmatmul.msk.f32.gmra.mxu2 %vm502_vm1, %v487_v32 }
 0x2fa   :  { %v791_v57 = vpop.xlane.xlu1 %790 }
 0x2fb   :  { %v827_v1 = vsub.f32 %v3794_v56, %v791_v57 }
 0x2fd   :  { %v848_v11 = vmul.f32 1.442695, %v827_v1 }
 0x305   :  { %v779_v34 = vpop.xlane.xlu2 %778 }
 0x306   :  { %v823_v53 = vsub.f32 %v3804_v0, %v779_v34 }
 0x308   :  { %v840_v61 = vmul.f32 1.442695, %v823_v53 }
 0x30a   :  { %3309 = vpow2.f32 %v840_v61 }
 0x30b   :  { %3311 = vpow2.f32 %v848_v11 }
 0x30d   :  { %v782_v36 = vpop.xlane.xlu2 %781 }
 0x30e   :  { %v824_v22 = vsub.f32 %v3811_v9, %v782_v36 }
 0x310   :  { %v3861_v21 = vpop.eup %3309  ;;  %v842_v32 = vmul.f32 1.442695, %v824_v22 }
 0x311   :  { %v873_v31 = vsel %vm773_vm2, %v3861_v21, 0.0  ;;  %v3874_v36 = vpop.eup %3311 }
 0x315   :  { %v785_v44 = vpop.xlane.xlu2 %784 }
 0x316   :  { %v642_v35 = vpop.f32.mrf.mxu2  ;;  %v825_v8 = vsub.f32 %v3818_v15, %v785_v44  ;;  %v776_v15 = vpop.xlane.xlu0 %775 }
 0x317   :  { %v743_v42 = vmul.f32 0.35355338, %v642_v35  ;;  %v822_v29 = vsub.f32 %v3788_v48, %v776_v15  ;;  %v885_v48 = vsel %vm773_vm2, %v3874_v36, 0.0 }
 0x318   :  { %v844_v18 = vmul.f32 1.442695, %v825_v8 }
 0x319   :  { %v3840_v45 = vadd.f32 %v3293_v37, %v743_v42 }
 0x31a   :  { %3313 = vpow2.f32 %v844_v18 }
 0x31b   :  { %v798_v50 = vsel %vm773_vm2, %v3840_v45, -inf  ;;  %3315 = vpow2.f32 %v842_v32 }
 0x31d   :  { %v788_v58 = vpop.xlane.xlu2 %787 }
 0x31e   :  { %v645_v38 = vpop.f32.mrf.mxu2 }
 0x31f   :  { %v744_v39 = vmul.f32 0.35355338, %v645_v38 }
 0x320   :  { %v700_v40 = vpop.f32.mrf.mxu1 }
 0x321   :  { %v3836_v41 = vadd.f32 %v3293_v37, %v744_v39  ;;  %v747_v54 = vmul.f32 0.35355338, %v700_v40  ;;  %v838_v39 = vmul.f32 1.442695, %v822_v29 }
 0x323   :  { %v801_v43 = vsel %vm773_vm2, %v3836_v41, -inf  ;;  %v3849_v63 = vadd.f32 %v3293_v37, %v747_v54 }
 0x324   :  { %802 = vmax.xlane.f32.xlu2 %v801_v43  ;;  %v826_v43 = vsub.f32 %v3823_v19, %v788_v58 }
 0x325   :  { %v810_v0 = vsel %vm773_vm2, %v3849_v63, -inf  ;;  %v797_v56 = vpop.xlane.xlu2 %796 }
 0x326   :  { %v829_v28 = vsub.f32 %v3829_v27, %v797_v56  ;;  %v3878_v27 = vpop.eup %3313 }
 0x327   :  { %v879_v44 = vsel %vm773_vm2, %v3878_v27, 0.0 }
 0x328   :  { %v703_v46 = vpop.f32.mrf.mxu1  ;;  %v852_v38 = vmul.f32 1.442695, %v829_v28 }
 0x329   :  { %v748_v47 = vmul.f32 0.35355338, %v703_v46  ;;  %v671_v49 = vpop.f32.mrf.mxu3  ;;  %v846_v46 = vmul.f32 1.442695, %v826_v43 }
 0x32a   :  { %v745_v12 = vmul.f32 0.35355338, %v671_v49  ;;  %3317 = vpow2.f32 %v852_v38  ;;  %v794_v49 = vpop.xlane.xlu1 %793 }
 0x32b   :  { %v3844_v51 = vadd.f32 %v3293_v37, %v748_v47  ;;  %3319 = vpow2.f32 %v838_v39  ;;  %v828_v54 = vsub.f32 %v3800_v60, %v794_v49 }
 0x32c   :  { %799 = vmax.xlane.f32.xlu2 %v798_v50  ;;  %v3864_v23 = vadd.f32 %v3293_v37, %v745_v12  ;;  %3321 = vpow2.f32 %v846_v46 }
 0x32d   :  { %v813_v55 = vsel %vm773_vm2, %v3844_v51, -inf  ;;  %v850_v57 = vmul.f32 1.442695, %v828_v54 }
 0x32e   :  { %814 = vmax.xlane.f32.xlu1 %v813_v55  ;;  %v804_v34 = vsel %vm773_vm2, %v3864_v23, -inf }
 0x32f   :  { %3323 = vpow2.f32 %v850_v57 }
 0x331   :  { %v674_v62 = vpop.f32.mrf.mxu3 }
 0x332   :  { %v746_v2 = vmul.f32 0.35355338, %v674_v62 }
 0x334   :  { %v3853_v10 = vadd.f32 %v3293_v37, %v746_v2 }
 0x336   :  { %v729_v13 = vpop.f32.mrf.mxu2  ;;  %811 = vmax.xlane.f32.xlu1 %v810_v0  ;;  %v807_v16 = vsel %vm773_vm2, %v3853_v10, -inf }
 0x337   :  { %v749_v17 = vmul.f32 0.35355338, %v729_v13  ;;  %808 = vmax.xlane.f32.xlu0 %v807_v16 }
 0x339   :  { %v3859_v20 = vadd.f32 %v3293_v37, %v749_v17 }
 0x33b   :  { %v816_v24 = vsel %vm773_vm2, %v3859_v20, -inf }
 0x33c   :  { %817 = vmax.xlane.f32.xlu2 %v816_v24 }
 0x33e   :  { %874 = vadd.xlane.f32.xlu1 %v873_v31  ;;  %v732_v9 = vpop.f32.mrf.mxu2 }
 0x33f   :  { %805 = vmax.xlane.f32.xlu0 %v804_v34  ;;  %v750_v35 = vmul.f32 0.35355338, %v732_v9 }
 0x341   :  { %v3876_v40 = vadd.f32 %v3293_v37, %v750_v35  ;;  %v3887_v37 = vpop.eup %3315 }
 0x342   :  { %v3889_v47 = vpop.eup %3317  ;;  %v876_v53 = vsel %vm773_vm2, %v3887_v37, 0.0 }
 0x343   :  { %v819_v42 = vsel %vm773_vm2, %v3876_v40, -inf  ;;  %v3891_v50 = vpop.eup %3319  ;;  %v891_v19 = vsel %vm773_vm2, %v3889_v47, 0.0 }
 0x344   :  { %886 = vadd.xlane.f32.xlu2 %v885_v48  ;;  %v870_v55 = vsel %vm773_vm2, %v3891_v50, 0.0  ;;  %v3900_v58 = vpop.eup %3321 }
 0x345   :  { %v882_v61 = vsel %vm773_vm2, %v3900_v58, 0.0  ;;  %v3904_v62 = vpop.eup %3323 }
 0x346   :  { %880 = vadd.xlane.f32.xlu1 %v879_v44  ;;  %v888_v60 = vsel %vm773_vm2, %v3904_v62, 0.0 }
 0x347   :  { %820 = vmax.xlane.f32.xlu0 %v819_v42 }
 0x34c   :  { %877 = vadd.xlane.f32.xlu2 %v876_v53 }
 0x34e   :  { %892 = vadd.xlane.f32.xlu1 %v891_v19 }
 0x34f   :  { %871 = vadd.xlane.f32.xlu0 %v870_v55 }
 0x357   :  { %883 = vadd.xlane.f32.xlu0 %v882_v61 }
 0x35f   :  { %889 = vadd.xlane.f32.xlu0 %v888_v60 }
 0x397   :  { %v803_v1 = vpop.xlane.xlu2 %802 }
 0x398   :  { %v831_v2 = vsub.f32 %v3836_v41, %v803_v1 }
 0x39a   :  { %v856_v8 = vmul.f32 1.442695, %v831_v2 }
 0x39c   :  { %3325 = vpow2.f32 %v856_v8 }
 0x39f   :  { %v800_v0 = vpop.xlane.xlu2 %799 }
 0x3a0   :  { %v830_v11 = vsub.f32 %v3840_v45, %v800_v0 }
 0x3a1   :  { %v815_v12 = vpop.xlane.xlu1 %814 }
 0x3a2   :  { %v3910_v13 = vpop.eup %3325  ;;  %v854_v16 = vmul.f32 1.442695, %v830_v11  ;;  %v835_v17 = vsub.f32 %v3844_v51, %v815_v12 }
 0x3a3   :  { %v897_v18 = vsel %vm773_vm2, %v3910_v13, 0.0 }
 0x3a4   :  { %3327 = vpow2.f32 %v854_v16  ;;  %v864_v56 = vmul.f32 1.442695, %v835_v17  ;;  %898 = vadd.xlane.f32.xlu1 %v897_v18 }
 0x3a6   :  { %3329 = vpow2.f32 %v864_v56 }
 0x3a9   :  { %v812_v15 = vpop.xlane.xlu1 %811 }
 0x3aa   :  { %v3915_v41 = vpop.eup %3327  ;;  %v834_v22 = vsub.f32 %v3849_v63, %v812_v15  ;;  %v809_v24 = vpop.xlane.xlu0 %808 }
 0x3ab   :  { %v833_v45 = vsub.f32 %v3853_v10, %v809_v24  ;;  %v894_v28 = vsel %vm773_vm2, %v3915_v41, 0.0 }
 0x3ac   :  { %v3921_v29 = vpop.eup %3329  ;;  %v862_v51 = vmul.f32 1.442695, %v834_v22  ;;  %895 = vadd.xlane.f32.xlu1 %v894_v28 }
 0x3ad   :  { %v860_v31 = vmul.f32 1.442695, %v833_v45  ;;  %v909_v32 = vsel %vm773_vm2, %v3921_v29, 0.0 }
 0x3ae   :  { %3331 = vpow2.f32 %v862_v51  ;;  %910 = vadd.xlane.f32.xlu0 %v909_v32 }
 0x3af   :  { %3333 = vpow2.f32 %v860_v31  ;;  %v818_v34 = vpop.xlane.xlu2 %817 }
 0x3b0   :  { %v836_v63 = vsub.f32 %v3859_v20, %v818_v34 }
 0x3b1   :  { %v875_v9 = vpop.xlane.xlu1 %874 }
 0x3b2   :  { %v866_v35 = vmul.f32 1.442695, %v836_v63  ;;  %3335 = vrcp.f32 %v875_v9  ;;  %v806_v10 = vpop.xlane.xlu0 %805 }
 0x3b3   :  { %v832_v38 = vsub.f32 %v3864_v23, %v806_v10 }
 0x3b4   :  { %v3927_v39 = vpop.eup %3331  ;;  %3337 = vpow2.f32 %v866_v35 }
 0x3b5   :  { %v3929_v48 = vpop.eup %3333  ;;  %v858_v42 = vmul.f32 1.442695, %v832_v38  ;;  %v906_v43 = vsel %vm773_vm2, %v3927_v39, 0.0 }
 0x3b6   :  { %907 = vadd.xlane.f32.xlu0 %v906_v43  ;;  %v903_v44 = vsel %vm773_vm2, %v3929_v48, 0.0 }
 0x3b7   :  { %3339 = vpow2.f32 %v858_v42  ;;  %v887_v20 = vpop.xlane.xlu2 %886  ;;  %904 = vadd.xlane.f32.xlu2 %v903_v44 }
 0x3b8   :  { %v3336_v46 = vpop.eup %3335 }
 0x3b9   :  { %v935_v49 = vmul.f32 %v3336_v46, %v3861_v21  ;;  %v881_v23 = vpop.xlane.xlu1 %880 }
 0x3ba   :  { %v3936_v53 = vpop.eup %3337  ;;  %3341 = vrcp.f32 %v881_v23  ;;  %v821_v54 = vpop.xlane.xlu0 %820  ;;  %v1248_v23 = vld [vmem:[%s4556_s4 + $0x10] sm:$0xff] }
 0x3bb   :  { %v837_v19 = vsub.f32 %v3876_v40, %v821_v54  ;;  %3158 = vmatpush.xpose.msk.msra.mxu3 %vm773_vm2, %v935_v49  ;;  %v912_v55 = vsel %vm773_vm2, %v3936_v53, 0.0  ;;  %v1249_v49 = vld [vmem:[%s4556_s4 + $0x18] sm:$0xff] }
 0x3bc   :  { %913 = vadd.xlane.f32.xlu1 %v912_v55 }
 0x3bd   :  { %v3942_v57 = vpop.eup %3339  ;;  %v868_v61 = vmul.f32 1.442695, %v837_v19 }
 0x3be   :  { %v900_v60 = vsel %vm773_vm2, %v3942_v57, 0.0 }
 0x3bf   :  { %3343 = vpow2.f32 %v868_v61  ;;  %v878_v21 = vpop.xlane.xlu2 %877  ;;  %901 = vadd.xlane.f32.xlu2 %v900_v60 }
 0x3c0   :  { %v3342_v1 = vpop.eup %3341  ;;  %3345 = vrcp.f32 %v878_v21 }
 0x3c1   :  { %3347 = vrcp.f32 %v887_v20  ;;  %v893_v2 = vpop.xlane.xlu1 %892  ;;  %v937_v40 = vmul.f32 %v3342_v1, %v3878_v27  ;;  %v3294_v1 = vld [vmem:[#allocation7] ss:$0 sm:$0xff] }
 0x3c2   :  { %3349 = vrcp.f32 %v893_v2  ;;  %v872_v8 = vpop.xlane.xlu0 %871 }
 0x3c3   :  { %3351 = vrcp.f32 %v872_v8  ;;  %3161 = vmatpush.xpose.msk.msrb.mxu0 %vm773_vm2, %v937_v40 }
 0x3c5   :  { %v3948_v0 = vpop.eup %3343 }
 0x3c6   :  { %v3346_v11 = vpop.eup %3345  ;;  %v915_v12 = vsel %vm773_vm2, %v3948_v0, 0.0 }
 0x3c7   :  { %v3348_v16 = vpop.eup %3347  ;;  %916 = vadd.xlane.f32.xlu2 %v915_v12  ;;  %v936_v17 = vmul.f32 %v3346_v11, %v3887_v37 }
 0x3c8   :  { %v3350_v18 = vpop.eup %3349  ;;  %v939_v24 = vmul.f32 %v3348_v16, %v3874_v36 }
 0x3c9   :  { %v3352_v56 = vpop.eup %3351  ;;  %v941_v15 = vmul.f32 %v3350_v18, %v3889_v47  ;;  %3162 = vmatpush.xpose.msk.msrb.mxu0 %vm773_vm2, %v936_v17 }
 0x3ca   :  { %v884_v27 = vpop.xlane.xlu0 %883  ;;  %v934_v22 = vmul.f32 %v3352_v56, %v3891_v50 }
 0x3cb   :  { %3353 = vrcp.f32 %v884_v27 }
 0x3cc   :  { %3159 = vmatpush.xpose.msk.msra.mxu3 %vm773_vm2, %v934_v22  ;;  %3163 = vmatmul.msk.f32.vlgmr.msrb.gmra.mxu0 %vm773_vm2, %v3774_v26 }
 0x3cd   :  { %3167 = vmatpush.xpose.msk.msra.mxu0 %vm773_vm2, %v941_v15  ;;  %v3634_v15 = vmov 32.0  }
 0x3cf   :  { %3160 = vmatmul.msk.f32.vlgmr.msra.gmra.mxu3 %vm773_vm2, %v3772_v25 }
 0x3d0   :  { %3164 = vmatpush.xpose.msk.msrb.mxu3 %vm773_vm2, %v939_v24 }
 0x3d1   :  { %v3354_v37 = vpop.eup %3353 }
 0x3d2   :  { %v890_v47 = vpop.xlane.xlu0 %889  ;;  %v938_v45 = vmul.f32 %v3354_v37, %v3900_v58 }
 0x3d3   :  { %3355 = vrcp.f32 %v890_v47 }
 0x3d4   :  { %3165 = vmatpush.xpose.msk.msrb.mxu3 %vm773_vm2, %v938_v45 }
 0x3d7   :  { %3166 = vmatmul.msk.f32.vlgmr.msrb.gmra.mxu3 %vm773_vm2, %v3778_v30 }
 0x3d9   :  { %v3356_v36 = vpop.eup %3355 }
 0x3da   :  { %v940_v50 = vmul.f32 %v3356_v36, %v3904_v62 }
 0x3dc   :  { %3168 = vmatpush.xpose.msk.msra.mxu0 %vm773_vm2, %v940_v50 }
 0x3df   :  { %3169 = vmatmul.msk.f32.vlgmr.msra.gmra.mxu0 %vm773_vm2, %v3783_v33 }
 0x417   :  { %v899_v26 = vpop.xlane.xlu1 %898 }
 0x418   :  { %3357 = vrcp.f32 %v899_v26 }
 0x41e   :  { %v3358_v25 = vpop.eup %3357 }
 0x41f   :  { %v943_v28 = vmul.f32 %v3358_v25, %v3910_v13  ;;  %v896_v58 = vpop.xlane.xlu1 %895 }
 0x420   :  { %3359 = vrcp.f32 %v896_v58 }
 0x421   :  { %3170 = vmatpush.xpose.msk.msrb.mxu1 %vm773_vm2, %v943_v28  ;;  %v911_v51 = vpop.xlane.xlu0 %910 }
 0x422   :  { %3361 = vrcp.f32 %v911_v51 }
 0x426   :  { %v3360_v30 = vpop.eup %3359 }
 0x427   :  { %v942_v31 = vmul.f32 %v3360_v30, %v3915_v41 }
 0x428   :  { %v3362_v62 = vpop.eup %3361 }
 0x429   :  { %v947_v32 = vmul.f32 %v3362_v62, %v3921_v29  ;;  %3171 = vmatpush.xpose.msk.msrb.mxu1 %vm773_vm2, %v942_v31  ;;  %v908_v33 = vpop.xlane.xlu0 %907 }
 0x42a   :  { %3363 = vrcp.f32 %v908_v33  ;;  %v905_v34 = vpop.xlane.xlu2 %904 }
 0x42b   :  { %3365 = vrcp.f32 %v905_v34  ;;  %3176 = vmatpush.xpose.msk.msra.mxu3 %vm773_vm2, %v947_v32 }
 0x42c   :  { %3172 = vmatmul.msk.f32.vlgmr.msrb.gmra.mxu1 %vm773_vm2, %v3792_v52 }
 0x42d   :  { %1278 = vmatpush.msra.mxu1 %v1249_v49 }
 0x42f   :  { %v914_v10 = vpop.xlane.xlu1 %913  ;;  %1279 = vmatpush.msra.mxu1 %v1248_v23 }
 0x430   :  { %v3364_v13 = vpop.eup %3363 }
 0x431   :  { %v3366_v63 = vpop.eup %3365  ;;  %v946_v9 = vmul.f32 %v3364_v13, %v3927_v39 }
 0x432   :  { %v945_v41 = vmul.f32 %v3366_v63, %v3929_v48  ;;  %v902_v35 = vpop.xlane.xlu2 %901 }
 0x433   :  { %3367 = vrcp.f32 %v902_v35  ;;  %3177 = vmatpush.xpose.msk.msra.mxu3 %vm773_vm2, %v946_v9 }
 0x434   :  { %3173 = vmatpush.xpose.msk.msrb.mxu2 %vm773_vm2, %v945_v41 }
 0x436   :  { %3178 = vmatmul.msk.f32.vlgmr.msra.gmra.mxu3 %vm773_vm2, %v3808_v3 }
 0x439   :  { %v3368_v29 = vpop.eup %3367 }
 0x43a   :  { %v917_v38 = vpop.xlane.xlu2 %916  ;;  %v944_v52 = vmul.f32 %v3368_v29, %v3942_v57 }
 0x43b   :  { %3369 = vrcp.f32 %v917_v38 }
 0x43c   :  { %3174 = vmatpush.xpose.msk.msrb.mxu2 %vm773_vm2, %v944_v52  ;;  %3371 = vrcp.f32 %v914_v10 }
 0x43d   :  { %3373 = vrcp.f32 %v3634_v15 }
 0x43f   :  { %3175 = vmatmul.msk.f32.vlgmr.msrb.gmra.mxu2 %vm773_vm2, %v3798_v59 }
 0x441   :  { %v3370_v39 = vpop.eup %3369 }
 0x442   :  { %v949_v48 = vmul.f32 %v3370_v39, %v3948_v0  ;;  %v3372_v42 = vpop.eup %3371  ;;  %v1413_v39 = vld [vmem:[%s4560_s8 + $0x18] sm:$0xff] }
 0x443   :  { %v948_v3 = vmul.f32 %v3372_v42, %v3936_v53  ;;  %v1246_v53 = vld [vmem:[%s4556_s4] sm:$0xff]  ;;  %1442 = vmatpush.msra.mxu2 %v1413_v39  ;;  %v1411_v42 = vld [vmem:[%s4560_s8 + $0x8] sm:$0xff] }
 0x444   :  { %3179 = vmatpush.xpose.msk.msrb.mxu0 %vm773_vm2, %v949_v48  ;;  %v1412_v48 = vld [vmem:[%s4560_s8 + $0x10] sm:$0xff] }
 0x445   :  { %1443 = vmatpush.msra.mxu2 %v1412_v48 }
 0x447   :  { %1444 = vmatpush.msra.mxu2 %v1411_v42  ;;  %v1464_v42 = vld [vmem:[%s4562_s10 + $0x8] sm:$0xff] }
 0x448   :  { %3180 = vmatpush.xpose.msk.msrb.mxu0 %vm773_vm2, %v948_v3  ;;  %v1410_v3 = vld [vmem:[%s4560_s8] sm:$0xff] }
 0x449   :  { %v1005_v44 = vpop.f32.mrf.mxu0  ;;  %1445 = vmatpush.msra.mxu2 %v1410_v3  ;;  %v1463_v3 = vld [vmem:[%s4562_s10] sm:$0xff] }
 0x44b   :  { %3181 = vmatmul.msk.f32.vlgmr.msrb.gmra.mxu0 %vm773_vm2, %v3816_v14  ;;  %v1247_v14 = vld [vmem:[%s4556_s4 + $0x8] sm:$0xff] }
 0x44c   :  { %1280 = vmatpush.msra.mxu1 %v1247_v14 }
 0x44e   :  { %1281 = vmatpush.msra.mxu1 %v1246_v53 }
 0x452   :  { %v976_v43 = vpop.f32.mrf.mxu3 }
 0x453   :  { %1182 = vxpose.xlu0.b32.start [1/4] (short) (narrow) %v976_v43, 16 }
 0x45a   :  { %v1034_v20 = vpop.f32.mrf.mxu3 }
 0x45b   :  { %1183 = vxpose.xlu0.b32.cont [2/4] (short) (narrow) %v1005_v44, 16 }
 0x45c   :  { %v1063_v59 = vpop.f32.mrf.mxu0 }
 0x463   :  { %1184 = vxpose.xlu0.b32.cont [3/4] (short) (narrow) %v1034_v20, 16 }
 0x46b   :  { %1185 = vxpose.xlu0.b32.end [4/4] (short) (narrow) %v1063_v59, 16 }
 0x4a9   :  { %v1092_v46 = vpop.f32.mrf.mxu1 }
 0x4aa   :  { %1214 = vxpose.xlu2.b32.start [1/4] (short) (narrow) %v1092_v46, 16 }
 0x4b9   :  { %v1150_v19 = vpop.f32.mrf.mxu3 }
 0x4c2   :  { %v1121_v54 = vpop.f32.mrf.mxu2 }
 0x4c3   :  { %1215 = vxpose.xlu2.b32.cont [2/4] (short) (narrow) %v1121_v54, 16 }
 0x4c8   :  { %v1179_v55 = vpop.f32.mrf.mxu0 }
 0x4cb   :  { %1216 = vxpose.xlu2.b32.cont [3/4] (short) (narrow) %v1150_v19, 16 }
 0x4d3   :  { %1217 = vxpose.xlu2.b32.end [4/4] (short) (narrow) %v1179_v55, 16 }
 0x4f7   :  { %v1198_v57 = vpop.trf.xlu0 }
 0x4f8   :  { %3182 = vmatmul.msk.f32.vlgmr.msra.gmra.mxu1 %vm140_vm0, %v1198_v57 }
 0x4ff   :  { %v1199_v61 = vpop.trf.xlu0 }
 0x500   :  { %3183 = vmatmul.msk.f32.gmra.mxu1 %vm140_vm0, %v1199_v61 }
 0x554   :  { %v1230_v60 = vpop.trf.xlu2 }
 0x555   :  { %3184 = vmatmul.msk.f32.gmra.mxu1 %vm140_vm0, %v1230_v60  ;;  %v4055_v60 = vld [vmem:[%s4558_s6] ss:$0 sm:$0xff] }
 0x55c   :  { %v1231_v21 = vpop.trf.xlu2 }
 0x55d   :  { %3185 = vmatmul.msk.f32.gmra.mxu1 %vm140_vm0, %v1231_v21 }
 0x575   :  { %v1283_v2 = vpop.f32.mrf.mxu1 }
 0x576   :  { %v1284_v40 = vadd.f32 %v3294_v1, %v1283_v2 }
 0x578   :  { %v1295_v8 = vadd.f32 %v1284_v40, %v3753_v4  ;;  %v3374_v4 = vpop.eup %3373  ;;  %v3296_v40 = vld [vmem:[#allocation8] ss:$0 sm:$0xff] }
 0x579   :  { %v1312_v47 = vmul.f32 32.0, %v3374_v4  ;;  %vm1316_vm3 = vweird.f32 %v3374_v4 }
 0x57a   :  { %v1299_v0 = vsel %vm140_vm0, %v1295_v8, 0.0 }
 0x57b   :  { %1300 = vadd.xlane.f32.xlu1 %v1299_v0  ;;  %v1313_v36 = vsub.f32 1.0, %v1312_v47  ;;  %v1468_v47 = vld [vmem:[%s4562_s10 + $0x28] sm:$0xff] }
 0x57d   :  { %v1286_v11 = vpop.f32.mrf.mxu1  ;;  %v1314_v50 = vmul.f32 %v3374_v4, %v1313_v36  ;;  %v1467_v36 = vld [vmem:[%s4562_s10 + $0x20] sm:$0xff] }
 0x57e   :  { %v1287_v12 = vadd.f32 %v3294_v1, %v1286_v11 }
 0x57f   :  { %v1315_v26 = vadd.f32 %v3374_v4, %v1314_v50 }
 0x580   :  { %v1296_v16 = vadd.f32 %v1287_v12, %v3757_v5 }
 0x581   :  { %v4020_v25 = vsel %vm1316_vm3, %v3374_v4, %v1315_v26  ;;  %vm1475_vm3 = vcmask 523264  }
 0x582   :  { %v1302_v17 = vsel %vm140_vm0, %v1296_v16, 0.0 }
 0x583   :  { %1303 = vadd.xlane.f32.xlu1 %v1302_v17 }
 0x5d2   :  { %v1289_v18 = vpop.f32.mrf.mxu1 }
 0x5d3   :  { %v1290_v56 = vadd.f32 %v3294_v1, %v1289_v18 }
 0x5d5   :  { %v1297_v27 = vadd.f32 %v1290_v56, %v3761_v6 }
 0x5d7   :  { %v1305_v22 = vsel %vm140_vm0, %v1297_v27, 0.0 }
 0x5d8   :  { %1306 = vadd.xlane.f32.xlu1 %v1305_v22 }
 0x5da   :  { %v1292_v24 = vpop.f32.mrf.mxu1 }
 0x5db   :  { %v1293_v37 = vadd.f32 %v3294_v1, %v1292_v24  ;;  %v1470_v24 = vld [vmem:[%s4562_s10 + $0x38] sm:$0xff] }
 0x5dc   :  { %1496 = vmatpush.msrb.mxu3 %v1470_v24 }
 0x5dd   :  { %v1298_v45 = vadd.f32 %v1293_v37, %v3765_v7  ;;  %v1469_v37 = vld [vmem:[%s4562_s10 + $0x30] sm:$0xff] }
 0x5de   :  { %1497 = vmatpush.msrb.mxu3 %v1469_v37 }
 0x5df   :  { %v1308_v5 = vsel %vm140_vm0, %v1298_v45, 0.0 }
 0x5e0   :  { %1309 = vadd.xlane.f32.xlu1 %v1308_v5  ;;  %1498 = vmatpush.msrb.mxu3 %v1468_v47 }
 0x5e2   :  { %1499 = vmatpush.msrb.mxu3 %v1467_v36 }
 0x5ee   :  { %v1301_v28 = vpop.xlane.xlu1 %1300 }
 0x5ef   :  { %v1318_v6 = vmul.f32 %v4020_v25, %v1301_v28  ;;  %v1466_v28 = vld [vmem:[%s4562_s10 + $0x18] sm:$0xff] }
 0x5f0   :  { %1500 = vmatpush.msrb.mxu3 %v1466_v28 }
 0x5f1   :  { %v1322_v58 = vsub.f32 %v1295_v8, %v1318_v6 }
 0x5f3   :  { %v1326_v51 = vmul.f32 %v1322_v58, %v1322_v58 }
 0x5f5   :  { %v1330_v30 = vsel %vm140_vm0, %v1326_v51, 0.0 }
 0x5f6   :  { %1331 = vadd.xlane.f32.xlu1 %v1330_v30  ;;  %v1304_v31 = vpop.xlane.xlu1 %1303 }
 0x5f7   :  { %v1319_v7 = vmul.f32 %v4020_v25, %v1304_v31 }
 0x5f9   :  { %v1323_v62 = vsub.f32 %v1296_v16, %v1319_v7 }
 0x5fb   :  { %v1327_v32 = vmul.f32 %v1323_v62, %v1323_v62 }
 0x5fd   :  { %v1333_v33 = vsel %vm140_vm0, %v1327_v32, 0.0 }
 0x5fe   :  { %1334 = vadd.xlane.f32.xlu1 %v1333_v33 }
 0x64b   :  { %v1307_v34 = vpop.xlane.xlu1 %1306 }
 0x64c   :  { %v1320_v13 = vmul.f32 %v4020_v25, %v1307_v34 }
 0x64e   :  { %v4027_v63 = vsub.f32 %v1297_v27, %v1320_v13 }
 0x650   :  { %v1328_v9 = vmul.f32 %v4027_v63, %v4027_v63 }
 0x652   :  { %v1336_v41 = vsel %vm140_vm0, %v1328_v9, 0.0 }
 0x653   :  { %1337 = vadd.xlane.f32.xlu1 %v1336_v41  ;;  %v1310_v35 = vpop.xlane.xlu1 %1309 }
 0x654   :  { %v1321_v29 = vmul.f32 %v4020_v25, %v1310_v35 }
 0x656   :  { %v4033_v10 = vsub.f32 %v1298_v45, %v1321_v29 }
 0x658   :  { %v1329_v38 = vmul.f32 %v4033_v10, %v4033_v10 }
 0x65a   :  { %v1339_v52 = vsel %vm140_vm0, %v1329_v38, 0.0 }
 0x65b   :  { %1340 = vadd.xlane.f32.xlu1 %v1339_v52 }
 0x669   :  { %v1332_v43 = vpop.xlane.xlu1 %1331 }
 0x66a   :  { %v1342_v44 = vmul.f32 %v1332_v43, %v4020_v25 }
 0x66c   :  { %v1346_v20 = vadd.f32 1e-05, %v1342_v44 }
 0x66e   :  { %3375 = vrsqrt.f32 %v1346_v20  ;;  %vm1356_vm5 = vweird.f32 %v1346_v20 }
 0x671   :  { %v1335_v59 = vpop.xlane.xlu1 %1334 }
 0x672   :  { %v1343_v46 = vmul.f32 %v1335_v59, %v4020_v25 }
 0x674   :  { %v3376_v49 = vpop.eup %3375  ;;  %v1347_v23 = vadd.f32 1e-05, %v1343_v46 }
 0x675   :  { %v1351_v14 = vmul.f32 %v3376_v49, %v1346_v20  ;;  %vm1357_vm4 = vweird.f32 %v3376_v49 }
 0x676   :  { %3377 = vrsqrt.f32 %v1347_v23  ;;  %vm1358_vm6 = vmor %vm1356_vm5, %vm1357_vm4  ;;  %vm1366_vm8 = vweird.f32 %v1347_v23 }
 0x677   :  { %v1352_v53 = vmul.f32 %v3376_v49, %v1351_v14 }
 0x679   :  { %v1353_v54 = vmul.f32 0.5, %v1352_v53 }
 0x67b   :  { %v1354_v19 = vsub.f32 1.5, %v1353_v54 }
 0x67c   :  { %v3378_v55 = vpop.eup %3377 }
 0x67d   :  { %v1355_v57 = vmul.f32 %v3376_v49, %v1354_v19  ;;  %v1361_v61 = vmul.f32 %v3378_v55, %v1347_v23  ;;  %vm1367_vm7 = vweird.f32 %v3378_v55 }
 0x67e   :  { %vm1368_vm9 = vmor %vm1366_vm8, %vm1367_vm7 }
 0x67f   :  { %v1359_v21 = vsel %vm1358_vm6, %v3376_v49, %v1355_v57  ;;  %v1362_v1 = vmul.f32 %v3378_v55, %v1361_v61  ;;  %v3298_v57 = vld [vmem:[%s4563_s11] ss:$0 sm:$0xff] }
 0x680   :  { %v1390_v2 = vmul.f32 %v1359_v21, %v1322_v58 }
 0x681   :  { %v1363_v8 = vmul.f32 0.5, %v1362_v1 }
 0x682   :  { %v1398_v0 = vmul.f32 %v4055_v60, %v1390_v2 }
 0x683   :  { %v1364_v11 = vsub.f32 1.5, %v1363_v8 }
 0x684   :  { %v4058_v12 = vadd.f32 %v3296_v40, %v1398_v0 }
 0x685   :  { %v1365_v16 = vmul.f32 %v3378_v55, %v1364_v11 }
 0x686   :  { %3186 = vmatmul.msk.f32.vlgmr.msra.gmra.mxu2 %vm140_vm0, %v4058_v12 }
 0x687   :  { %v1369_v17 = vsel %vm1368_vm9, %v3378_v55, %v1365_v16 }
 0x688   :  { %v1391_v18 = vmul.f32 %v1369_v17, %v1323_v62 }
 0x68a   :  { %v1399_v56 = vmul.f32 %v4055_v60, %v1391_v18 }
 0x68c   :  { %v4063_v15 = vadd.f32 %v3296_v40, %v1399_v56 }
 0x68e   :  { %3187 = vmatmul.msk.f32.gmra.mxu2 %vm140_vm0, %v4063_v15 }
 0x6c6   :  { %v1338_v27 = vpop.xlane.xlu1 %1337 }
 0x6c7   :  { %v1344_v22 = vmul.f32 %v1338_v27, %v4020_v25 }
 0x6c9   :  { %v1348_v4 = vadd.f32 1e-05, %v1344_v22 }
 0x6cb   :  { %3379 = vrsqrt.f32 %v1348_v4  ;;  %vm1376_vm11 = vweird.f32 %v1348_v4 }
 0x6ce   :  { %v1341_v45 = vpop.xlane.xlu1 %1340 }
 0x6cf   :  { %v1345_v5 = vmul.f32 %v1341_v45, %v4020_v25 }
 0x6d1   :  { %v3380_v50 = vpop.eup %3379  ;;  %v1349_v26 = vadd.f32 1e-05, %v1345_v5 }
 0x6d2   :  { %v1371_v6 = vmul.f32 %v3380_v50, %v1348_v4  ;;  %vm1377_vm10 = vweird.f32 %v3380_v50 }
 0x6d3   :  { %3381 = vrsqrt.f32 %v1349_v26  ;;  %vm1378_vm12 = vmor %vm1376_vm11, %vm1377_vm10  ;;  %vm1386_vm14 = vweird.f32 %v1349_v26 }
 0x6d4   :  { %v1372_v58 = vmul.f32 %v3380_v50, %v1371_v6 }
 0x6d6   :  { %v1373_v51 = vmul.f32 0.5, %v1372_v58 }
 0x6d8   :  { %v1374_v30 = vsub.f32 1.5, %v1373_v51 }
 0x6d9   :  { %v3382_v31 = vpop.eup %3381 }
 0x6da   :  { %v1375_v7 = vmul.f32 %v3380_v50, %v1374_v30  ;;  %v1381_v62 = vmul.f32 %v3382_v31, %v1349_v26  ;;  %vm1387_vm13 = vweird.f32 %v3382_v31 }
 0x6db   :  { %vm1388_vm15 = vmor %vm1386_vm14, %vm1387_vm13 }
 0x6dc   :  { %v1379_v32 = vsel %vm1378_vm12, %v3380_v50, %v1375_v7  ;;  %v1382_v33 = vmul.f32 %v3382_v31, %v1381_v62 }
 0x6dd   :  { %v1392_v34 = vmul.f32 %v1379_v32, %v4027_v63  ;;  %v1465_v63 = vld [vmem:[%s4562_s10 + $0x10] sm:$0xff] }
 0x6de   :  { %v1383_v13 = vmul.f32 0.5, %v1382_v33  ;;  %1501 = vmatpush.msrb.mxu3 %v1465_v63 }
 0x6df   :  { %v1400_v9 = vmul.f32 %v4055_v60, %v1392_v34  ;;  %v3197_v34 = vld [vmem:[%s4554_s2 + $0x38] sm:$0xff] }
 0x6e0   :  { %v1384_v41 = vsub.f32 1.5, %v1383_v13  ;;  %1502 = vmatpush.msrb.mxu3 %v1464_v42  ;;  %1659 = vmatpush.msra.mxu0 %v3197_v34  ;;  %v3196_v13 = vld [vmem:[%s4554_s2 + $0x30] sm:$0xff] }
 0x6e1   :  { %v1408_v35 = vadd.f32 %v3296_v40, %v1400_v9  ;;  %3275 = vmatpush.msrb.mxu1 %v3197_v34  ;;  %v3195_v9 = vld [vmem:[%s4554_s2 + $0x28] sm:$0xff] }
 0x6e2   :  { %v1385_v29 = vmul.f32 %v3382_v31, %v1384_v41  ;;  %1503 = vmatpush.msrb.mxu3 %v1463_v3  ;;  %1660 = vmatpush.msra.mxu0 %v3196_v13  ;;  %v3194_v41 = vld [vmem:[%s4554_s2 + $0x20] sm:$0xff] }
 0x6e3   :  { %3188 = vmatmul.msk.f32.gmra.mxu2 %vm140_vm0, %v1408_v35  ;;  %3276 = vmatpush.msrb.mxu1 %v3196_v13 }
 0x6e4   :  { %v1389_v38 = vsel %vm1388_vm15, %v3382_v31, %v1385_v29  ;;  %1661 = vmatpush.msra.mxu0 %v3195_v9 }
 0x6e5   :  { %v1393_v52 = vmul.f32 %v1389_v38, %v4033_v10  ;;  %v3297_v10 = vld [vmem:[%s4561_s9] ss:$0 sm:$0xff]  ;;  %3277 = vmatpush.msrb.mxu1 %v3195_v9 }
 0x6e6   :  { %1662 = vmatpush.msra.mxu0 %v3194_v41 }
 0x6e7   :  { %v1401_v39 = vmul.f32 %v4055_v60, %v1393_v52  ;;  %3278 = vmatpush.msrb.mxu1 %v3194_v41 }
 0x6e9   :  { %v1409_v48 = vadd.f32 %v3296_v40, %v1401_v39 }
 0x6eb   :  { %3189 = vmatmul.msk.f32.gmra.mxu2 %vm140_vm0, %v1409_v48 }
 0x709   :  { %v1447_v43 = vpop.f32.mrf.mxu2 }
 0x70a   :  { %v1448_v44 = vadd.f32 %v3297_v10, %v1447_v43 }
 0x70c   :  { %v1459_v20 = vmax.f32 %v1448_v44, 0.0 }
 0x70e   :  { %3190 = vmatmul.msk.f32.vlgmr.msrb.gmra.mxu3 %vm1475_vm3, %v1459_v20 }
 0x711   :  { %v1450_v59 = vpop.f32.mrf.mxu2 }
 0x712   :  { %v1451_v46 = vadd.f32 %v3297_v10, %v1450_v59 }
 0x714   :  { %v1460_v49 = vmax.f32 %v1451_v46, 0.0  ;;  %v3299_v46 = vld [vmem:[%s4564_s12] ss:$0 sm:$0xff] }
 0x716   :  { %3191 = vmatmul.msk.f32.gmra.mxu3 %vm1475_vm3, %v1460_v49 }
 0x766   :  { %v1453_v23 = vpop.f32.mrf.mxu2 }
 0x767   :  { %v1454_v14 = vadd.f32 %v3297_v10, %v1453_v23 }
 0x769   :  { %v1461_v53 = vmax.f32 %v1454_v14, 0.0 }
 0x76b   :  { %3192 = vmatmul.msk.f32.gmra.mxu3 %vm1475_vm3, %v1461_v53  ;;  %v3300_v53 = vld [vmem:[#allocation10] ss:$0 sm:$0xff] }
 0x76e   :  { %v1456_v54 = vpop.f32.mrf.mxu2 }
 0x76f   :  { %v1457_v19 = vadd.f32 %v3297_v10, %v1456_v54 }
 0x771   :  { %v1462_v55 = vmax.f32 %v1457_v19, 0.0 }
 0x773   :  { %3193 = vmatmul.msk.f32.gmra.mxu3 %vm1475_vm3, %v1462_v55 }
 0x791   :  { %v1505_v61 = vpop.f32.mrf.mxu3 }
 0x792   :  { %v1506_v60 = vadd.f32 %v3298_v57, %v1505_v61 }
 0x794   :  { %v1517_v21 = vadd.f32 %v1506_v60, %v4058_v12 }
 0x796   :  { %v1521_v1 = vsel %vm140_vm0, %v1517_v21, 0.0 }
 0x797   :  { %1522 = vadd.xlane.f32.xlu0 %v1521_v1 }
 0x799   :  { %v1508_v2 = vpop.f32.mrf.mxu3 }
 0x79a   :  { %v1509_v40 = vadd.f32 %v3298_v57, %v1508_v2 }
 0x79c   :  { %v1518_v8 = vadd.f32 %v1509_v40, %v4063_v15 }
 0x79e   :  { %v1524_v0 = vsel %vm140_vm0, %v1518_v8, 0.0 }
 0x79f   :  { %1525 = vadd.xlane.f32.xlu2 %v1524_v0 }
 0x7ee   :  { %v1511_v11 = vpop.f32.mrf.mxu3 }
 0x7ef   :  { %v1512_v16 = vadd.f32 %v3298_v57, %v1511_v11 }
 0x7f1   :  { %v1519_v17 = vadd.f32 %v1512_v16, %v1408_v35 }
 0x7f3   :  { %v1527_v18 = vsel %vm140_vm0, %v1519_v17, 0.0 }
 0x7f4   :  { %1528 = vadd.xlane.f32.xlu1 %v1527_v18 }
 0x7f6   :  { %v1514_v56 = vpop.f32.mrf.mxu3 }
 0x7f7   :  { %v1515_v27 = vadd.f32 %v3298_v57, %v1514_v56 }
 0x7f9   :  { %v1520_v22 = vadd.f32 %v1515_v27, %v1409_v48 }
 0x7fb   :  { %v1530_v12 = vsel %vm140_vm0, %v1520_v22, 0.0 }
 0x7fc   :  { %1531 = vadd.xlane.f32.xlu1 %v1530_v12 }
 0x80a   :  { %v1523_v4 = vpop.xlane.xlu0 %1522 }
 0x80b   :  { %v1533_v24 = vmul.f32 %v1523_v4, %v4020_v25 }
 0x80d   :  { %v1537_v37 = vsub.f32 %v1517_v21, %v1533_v24 }
 0x80f   :  { %v1541_v15 = vmul.f32 %v1537_v37, %v1537_v37 }
 0x811   :  { %v1545_v47 = vsel %vm140_vm0, %v1541_v15, 0.0 }
 0x812   :  { %v1526_v45 = vpop.xlane.xlu2 %1525  ;;  %1546 = vadd.xlane.f32.xlu1 %v1545_v47 }
 0x813   :  { %v1534_v5 = vmul.f32 %v1526_v45, %v4020_v25 }
 0x815   :  { %v4118_v36 = vsub.f32 %v1518_v8, %v1534_v5 }
 0x817   :  { %v1542_v50 = vmul.f32 %v4118_v36, %v4118_v36 }
 0x819   :  { %v1548_v26 = vsel %vm140_vm0, %v1542_v50, 0.0 }
 0x81a   :  { %1549 = vadd.xlane.f32.xlu1 %v1548_v26 }
 0x867   :  { %v1529_v28 = vpop.xlane.xlu1 %1528 }
 0x868   :  { %v1535_v6 = vmul.f32 %v1529_v28, %v4020_v25 }
 0x86a   :  { %v4124_v58 = vsub.f32 %v1519_v17, %v1535_v6 }
 0x86c   :  { %v1543_v51 = vmul.f32 %v4124_v58, %v4124_v58 }
 0x86e   :  { %v1551_v30 = vsel %vm140_vm0, %v1543_v51, 0.0 }
 0x86f   :  { %1552 = vadd.xlane.f32.xlu1 %v1551_v30  ;;  %v1532_v31 = vpop.xlane.xlu1 %1531 }
 0x870   :  { %v1536_v7 = vmul.f32 %v1532_v31, %v4020_v25 }
 0x872   :  { %v4130_v62 = vsub.f32 %v1520_v22, %v1536_v7 }
 0x874   :  { %v1544_v32 = vmul.f32 %v4130_v62, %v4130_v62 }
 0x876   :  { %v1554_v33 = vsel %vm140_vm0, %v1544_v32, 0.0 }
 0x877   :  { %1555 = vadd.xlane.f32.xlu1 %v1554_v33 }
 0x885   :  { %v1547_v35 = vpop.xlane.xlu1 %1546 }
 0x886   :  { %v1557_v29 = vmul.f32 %v1547_v35, %v4020_v25 }
 0x888   :  { %v1561_v38 = vadd.f32 1e-05, %v1557_v29 }
 0x88a   :  { %3383 = vrsqrt.f32 %v1561_v38  ;;  %vm1571_vm5 = vweird.f32 %v1561_v38 }
 0x88d   :  { %v1550_v52 = vpop.xlane.xlu1 %1549 }
 0x88e   :  { %v1558_v39 = vmul.f32 %v1550_v52, %v4020_v25 }
 0x890   :  { %v3384_v63 = vpop.eup %3383  ;;  %v1562_v48 = vadd.f32 1e-05, %v1558_v39 }
 0x891   :  { %v1566_v42 = vmul.f32 %v3384_v63, %v1561_v38  ;;  %vm1572_vm4 = vweird.f32 %v3384_v63 }
 0x892   :  { %3385 = vrsqrt.f32 %v1562_v48  ;;  %vm1573_vm6 = vmor %vm1571_vm5, %vm1572_vm4  ;;  %vm1581_vm8 = vweird.f32 %v1562_v48 }
 0x893   :  { %v1567_v3 = vmul.f32 %v3384_v63, %v1566_v42 }
 0x895   :  { %v1568_v10 = vmul.f32 0.5, %v1567_v3 }
 0x897   :  { %v1569_v43 = vsub.f32 1.5, %v1568_v10 }
 0x898   :  { %v3386_v44 = vpop.eup %3385 }
 0x899   :  { %v1570_v20 = vmul.f32 %v3384_v63, %v1569_v43  ;;  %v1576_v59 = vmul.f32 %v3386_v44, %v1562_v48  ;;  %vm1582_vm7 = vweird.f32 %v3386_v44 }
 0x89a   :  { %vm1583_vm9 = vmor %vm1581_vm8, %vm1582_vm7 }
 0x89b   :  { %v1574_v49 = vsel %vm1573_vm6, %v3384_v63, %v1570_v20  ;;  %v1577_v23 = vmul.f32 %v3386_v44, %v1576_v59 }
 0x89c   :  { %v1605_v14 = vmul.f32 %v1574_v49, %v1537_v37 }
 0x89d   :  { %v1578_v54 = vmul.f32 0.5, %v1577_v23 }
 0x89e   :  { %v1613_v19 = vmul.f32 %v3299_v46, %v1605_v14 }
 0x89f   :  { %v1579_v55 = vsub.f32 1.5, %v1578_v54 }
 0x8a0   :  { %v4152_v57 = vadd.f32 %v3300_v53, %v1613_v19 }
 0x8a1   :  { %v1580_v61 = vmul.f32 %v3386_v44, %v1579_v55 }
 0x8a2   :  { %3199 = vmatmul.msk.f32.vlgmr.msra.gmra.mxu0 %vm140_vm0, %v4152_v57 }
 0x8a3   :  { %v1584_v60 = vsel %vm1583_vm9, %v3386_v44, %v1580_v61 }
 0x8a4   :  { %v1606_v21 = vmul.f32 %v1584_v60, %v4118_v36 }
 0x8a6   :  { %v1614_v1 = vmul.f32 %v3299_v46, %v1606_v21 }
 0x8a8   :  { %v4157_v2 = vadd.f32 %v3300_v53, %v1614_v1 }
 0x8aa   :  { %3200 = vmatmul.msk.f32.gmra.mxu0 %vm140_vm0, %v4157_v2 }
 0x8e2   :  { %v1553_v40 = vpop.xlane.xlu1 %1552 }
 0x8e3   :  { %v1559_v8 = vmul.f32 %v1553_v40, %v4020_v25 }
 0x8e5   :  { %v1563_v0 = vadd.f32 1e-05, %v1559_v8 }
 0x8e7   :  { %3387 = vrsqrt.f32 %v1563_v0  ;;  %vm1591_vm11 = vweird.f32 %v1563_v0 }
 0x8ea   :  { %v1556_v11 = vpop.xlane.xlu1 %1555 }
 0x8eb   :  { %v1560_v16 = vmul.f32 %v1556_v11, %v4020_v25 }
 0x8ed   :  { %v3388_v17 = vpop.eup %3387  ;;  %v1564_v18 = vadd.f32 1e-05, %v1560_v16 }
 0x8ee   :  { %v1586_v56 = vmul.f32 %v3388_v17, %v1563_v0  ;;  %vm1592_vm10 = vweird.f32 %v3388_v17 }
 0x8ef   :  { %3389 = vrsqrt.f32 %v1564_v18  ;;  %vm1593_vm12 = vmor %vm1591_vm11, %vm1592_vm10  ;;  %vm1601_vm14 = vweird.f32 %v1564_v18 }
 0x8f0   :  { %v1587_v27 = vmul.f32 %v3388_v17, %v1586_v56 }
 0x8f2   :  { %v1588_v22 = vmul.f32 0.5, %v1587_v27 }
 0x8f4   :  { %v1589_v12 = vsub.f32 1.5, %v1588_v22 }
 0x8f5   :  { %v3390_v4 = vpop.eup %3389 }
 0x8f6   :  { %v1590_v24 = vmul.f32 %v3388_v17, %v1589_v12  ;;  %v1596_v37 = vmul.f32 %v3390_v4, %v1564_v18  ;;  %vm1602_vm13 = vweird.f32 %v3390_v4 }
 0x8f7   :  { %vm1603_vm15 = vmor %vm1601_vm14, %vm1602_vm13 }
 0x8f8   :  { %v1594_v15 = vsel %vm1593_vm12, %v3388_v17, %v1590_v24  ;;  %v1597_v47 = vmul.f32 %v3390_v4, %v1596_v37 }
 0x8f9   :  { %v1607_v45 = vmul.f32 %v1594_v15, %v4124_v58  ;;  %v3301_v58 = vld [vmem:[%s4555_s3 + $0x1] ss:$0 sm:$0xff] }
 0x8fa   :  { %v1598_v5 = vmul.f32 0.5, %v1597_v47 }
 0x8fb   :  { %v1615_v36 = vmul.f32 %v3299_v46, %v1607_v45 }
 0x8fc   :  { %v1599_v50 = vsub.f32 1.5, %v1598_v5  ;;  %v3471_v5 = vld [vmem:[#allocation5] ss:$0 sm:$0xff] }
 0x8fd   :  { %v4164_v26 = vadd.f32 %v3300_v53, %v1615_v36 }
 0x8fe   :  { %v1600_v28 = vmul.f32 %v3390_v4, %v1599_v50 }
 0x8ff   :  { %3201 = vmatmul.msk.f32.vlgmr.msrb.gmra.mxu1 %vm140_vm0, %v4164_v26 }
 0x900   :  { %v1604_v6 = vsel %vm1603_vm15, %v3390_v4, %v1600_v28 }
 0x901   :  { %v1608_v51 = vmul.f32 %v1604_v6, %v4130_v62 }
 0x903   :  { %v1616_v30 = vmul.f32 %v3299_v46, %v1608_v51 }
 0x905   :  { %v4169_v31 = vadd.f32 %v3300_v53, %v1616_v30 }
 0x907   :  { %3202 = vmatmul.msk.f32.gmra.mxu1 %vm140_vm0, %v4169_v31 }
 0x91f   :  { %v1664_v7 = vpop.f32.mrf.mxu0 }
 0x920   :  { %v1665_v32 = vadd.f32 %v3301_v58, %v1664_v7 }
 0x922   :  { %1676 = vxpose.xlu1.b32.start [1/2] (short) (narrow) %v1665_v32, 96 }
 0x927   :  { %v1667_v33 = vpop.f32.mrf.mxu0 }
 0x928   :  { %v1668_v34 = vadd.f32 %v3301_v58, %v1667_v33 }
 0x92a   :  { %1677 = vxpose.xlu1.b32.end [2/2] (short) (narrow) %v1668_v34, 96 }
 0x97c   :  { %v1670_v13 = vpop.f32.mrf.mxu1 }
 0x97d   :  { %v1671_v9 = vadd.f32 %v3301_v58, %v1670_v13 }
 0x97f   :  { %1708 = vxpose.xlu0.b32.start [1/2] (short) (narrow) %v1671_v9, 96 }
 0x984   :  { %v1673_v62 = vpop.f32.mrf.mxu1 }
 0x985   :  { %v1674_v41 = vadd.f32 %v3301_v58, %v1673_v62 }
 0x987   :  { %1709 = vxpose.xlu0.b32.end [2/2] (short) (narrow) %v1674_v41, 96 }
 0x9c6   :  { %v1692_v35 = vpop.trf.xlu1 }
 0x9c7   :  { %1740 = vxpose.xlu1.b32.start.end [1/1] (short) (narrow) %v1692_v35, 16 }
 0x9ce   :  { %v1693_v29 = vpop.trf.xlu1 }
 0x9cf   :  { %1772 = vxpose.xlu2.b32.start.end [1/1] (short) (narrow) %v1693_v29, 16 }
 0x9d6   :  { %v1694_v38 = vpop.trf.xlu1 }
 0x9de   :  { %v1695_v52 = vpop.trf.xlu1 }
 0x9df   :  { %1804 = vxpose.xlu0.b32.start.end [1/1] (short) (narrow) %v1694_v38, 16  ;;  %1836 = vxpose.xlu2.b32.start.end [1/1] (short) (narrow) %v1695_v52, 16 }
 0x9e6   :  { %v1696_v39 = vpop.trf.xlu1 }
 0x9e7   :  { %2017 = vmatpush.msra.mxu1 %v1696_v39 }
 0x9ee   :  { %v1697_v63 = vpop.trf.xlu1 }
 0x9ef   :  { %2046 = vmatpush.msrb.mxu2 %v1697_v63 }
 0x9f6   :  { %v1698_v48 = vpop.trf.xlu1 }
 0x9f7   :  { %2075 = vmatpush.msrb.mxu0 %v1698_v48 }
 0x9fe   :  { %v1699_v3 = vpop.trf.xlu1 }
 0x9ff   :  { %2104 = vmatpush.msra.mxu3 %v1699_v3 }
 0xa06   :  { %v4176_v59 = vpop.trf.xlu1 }
 0xa0e   :  { %v4178_v49 = vpop.trf.xlu1 }
 0xa16   :  { %v4180_v14 = vpop.trf.xlu1 }
 0xa1e   :  { %v4182_v54 = vpop.trf.xlu1 }
 0xa23   :  { %v1724_v42 = vpop.trf.xlu0 }
 0xa24   :  { %1868 = vxpose.xlu2.b32.start.end [1/1] (short) (narrow) %v1724_v42, 16 }
 0xa2b   :  { %v1725_v10 = vpop.trf.xlu0 }
 0xa33   :  { %v1726_v43 = vpop.trf.xlu0 }
 0xa34   :  { %1932 = vxpose.xlu1.b32.start.end [1/1] (short) (narrow) %v1726_v43, 16  ;;  %1900 = vxpose.xlu2.b32.start.end [1/1] (short) (narrow) %v1725_v10, 16  ;;  %v3472_v10 = vld [vmem:[#allocation5 + $0x1] ss:$0 sm:$0xff] }
 0xa3b   :  { %v1727_v44 = vpop.trf.xlu0 }
 0xa43   :  { %v1728_v20 = vpop.trf.xlu0 }
 0xa44   :  { %1964 = vxpose.xlu2.b32.start.end [1/1] (short) (narrow) %v1727_v44, 16  ;;  %2133 = vmatpush.msrb.mxu1 %v1728_v20 }
 0xa4b   :  { %v1729_v46 = vpop.trf.xlu0 }
 0xa4c   :  { %2162 = vmatpush.msra.mxu2 %v1729_v46 }
 0xa53   :  { %v1730_v23 = vpop.trf.xlu0 }
 0xa54   :  { %2191 = vmatpush.msra.mxu0 %v1730_v23 }
 0xa5b   :  { %v1731_v53 = vpop.trf.xlu0 }
 0xa5c   :  { %2220 = vmatpush.msrb.mxu3 %v1731_v53 }
 0xa63   :  { %v4184_v19 = vpop.trf.xlu0 }
 0xa68   :  { %v1788_v55 = vpop.trf.xlu2 }
 0xa69   :  { %3205 = vmatmul.msk.f32.vlgmr.msrb.gmra.mxu2 %vm502_vm1, %v1788_v55 }
 0xa6b   :  { %v4187_v61 = vpop.trf.xlu0  ;;  %v1756_v60 = vpop.trf.xlu1 }
 0xa6c   :  { %3203 = vmatmul.msk.f32.vlgmr.msra.gmra.mxu1 %vm502_vm1, %v1756_v60 }
 0xa70   :  { %v1789_v21 = vpop.trf.xlu2 }
 0xa71   :  { %3206 = vmatmul.msk.f32.gmra.mxu2 %vm502_vm1, %v1789_v21 }
 0xa73   :  { %v4191_v1 = vpop.trf.xlu0  ;;  %v1757_v40 = vpop.trf.xlu1 }
 0xa74   :  { %3204 = vmatmul.msk.f32.gmra.mxu1 %vm502_vm1, %v1757_v40 }
 0xa78   :  { %v1852_v8 = vpop.trf.xlu2 }
 0xa79   :  { %3209 = vmatmul.msk.f32.vlgmr.msra.gmra.mxu3 %vm502_vm1, %v1852_v8 }
 0xa7b   :  { %v4195_v0 = vpop.trf.xlu0 }
 0xa80   :  { %v1853_v11 = vpop.trf.xlu2 }
 0xa81   :  { %3210 = vmatmul.msk.f32.gmra.mxu3 %vm502_vm1, %v1853_v11 }
 0xa83   :  { %v1820_v16 = vpop.trf.xlu0 }
 0xa84   :  { %3207 = vmatmul.msk.f32.vlgmr.msrb.gmra.mxu0 %vm502_vm1, %v1820_v16 }
 0xa8b   :  { %v1821_v17 = vpop.trf.xlu0 }
 0xa8c   :  { %3208 = vmatmul.msk.f32.gmra.mxu0 %vm502_vm1, %v1821_v17 }
 0xabd   :  { %v1884_v18 = vpop.trf.xlu2 }
 0xabe   :  { %3211 = vmatmul.msk.f32.vlgmr.msrb.gmra.mxu1 %vm502_vm1, %v1884_v18 }
 0xac5   :  { %v1885_v56 = vpop.trf.xlu2 }
 0xac6   :  { %3212 = vmatmul.msk.f32.gmra.mxu1 %vm502_vm1, %v1885_v56 }
 0xacd   :  { %v1916_v27 = vpop.trf.xlu2 }
 0xace   :  { %3213 = vmatmul.msk.f32.vlgmr.msra.gmra.mxu2 %vm502_vm1, %v1916_v27 }
 0xad5   :  { %v1917_v22 = vpop.trf.xlu2 }
 0xad6   :  { %3214 = vmatmul.msk.f32.gmra.mxu2 %vm502_vm1, %v1917_v22 }
 0xad8   :  { %v1948_v12 = vpop.trf.xlu1 }
 0xad9   :  { %3215 = vmatmul.msk.f32.vlgmr.msra.gmra.mxu0 %vm502_vm1, %v1948_v12 }
 0xadd   :  { %v1980_v4 = vpop.trf.xlu2 }
 0xade   :  { %3217 = vmatmul.msk.f32.vlgmr.msrb.gmra.mxu3 %vm502_vm1, %v1980_v4 }
 0xae0   :  { %v1949_v24 = vpop.trf.xlu1 }
 0xae1   :  { %3216 = vmatmul.msk.f32.gmra.mxu0 %vm502_vm1, %v1949_v24 }
 0xae5   :  { %v1981_v37 = vpop.trf.xlu2 }
 0xae6   :  { %3218 = vmatmul.msk.f32.gmra.mxu3 %vm502_vm1, %v1981_v37 }
 0xae9   :  { %v2019_v15 = vpop.f32.mrf.mxu1 }
 0xaea   :  { %v2228_v51 = vmul.f32 0.35355338, %v2019_v15 }
 0xaec   :  { %v2048_v47 = vpop.f32.mrf.mxu2  ;;  %v4218_v34 = vadd.f32 %v3471_v5, %v2228_v51 }
 0xaed   :  { %v2230_v45 = vmul.f32 0.35355338, %v2048_v47 }
 0xaee   :  { %v2260_v9 = vsel %vm773_vm2, %v4218_v34, -inf }
 0xaef   :  { %v4208_v36 = vadd.f32 %v3471_v5, %v2230_v45 }
 0xaf1   :  { %v2022_v50 = vpop.f32.mrf.mxu1  ;;  %v2266_v28 = vsel %vm773_vm2, %v4208_v36, -inf }
 0xaf2   :  { %v2229_v6 = vmul.f32 0.35355338, %v2022_v50  ;;  %2267 = vmax.xlane.f32.xlu0 %v2266_v28 }
 0xaf4   :  { %v4212_v30 = vadd.f32 %v3471_v5, %v2229_v6  ;;  %v2051_v58 = vpop.f32.mrf.mxu2 }
 0xaf5   :  { %v2231_v7 = vmul.f32 0.35355338, %v2051_v58 }
 0xaf6   :  { %v2263_v32 = vsel %vm773_vm2, %v4212_v30, -inf }
 0xaf7   :  { %2264 = vmax.xlane.f32.xlu1 %v2263_v32  ;;  %v4216_v33 = vadd.f32 %v3471_v5, %v2231_v7 }
 0xaf9   :  { %v2269_v13 = vsel %vm773_vm2, %v4216_v33, -inf }
 0xafa   :  { %2270 = vmax.xlane.f32.xlu2 %v2269_v13 }
 0xafc   :  { %v2106_v48 = vpop.f32.mrf.mxu3 }
 0xafd   :  { %v2234_v44 = vmul.f32 0.35355338, %v2106_v48 }
 0xaff   :  { %2261 = vmax.xlane.f32.xlu1 %v2260_v9  ;;  %v4236_v23 = vadd.f32 %v3471_v5, %v2234_v44 }
 0xb01   :  { %v2077_v62 = vpop.f32.mrf.mxu0  ;;  %v2278_v40 = vsel %vm773_vm2, %v4236_v23, -inf }
 0xb02   :  { %v2232_v41 = vmul.f32 0.35355338, %v2077_v62 }
 0xb04   :  { %v4224_v35 = vadd.f32 %v3471_v5, %v2232_v41  ;;  %v2109_v55 = vpop.f32.mrf.mxu3 }
 0xb05   :  { %v2235_v21 = vmul.f32 0.35355338, %v2109_v55 }
 0xb06   :  { %v2272_v29 = vsel %vm773_vm2, %v4224_v35, -inf }
 0xb07   :  { %2273 = vmax.xlane.f32.xlu1 %v2272_v29  ;;  %v4244_v11 = vadd.f32 %v3471_v5, %v2235_v21 }
 0xb09   :  { %v2080_v38 = vpop.f32.mrf.mxu0  ;;  %v2281_v16 = vsel %vm773_vm2, %v4244_v11, -inf }
 0xb0a   :  { %v2233_v52 = vmul.f32 0.35355338, %v2080_v38 }
 0xb0c   :  { %v4228_v39 = vadd.f32 %v3471_v5, %v2233_v52 }
 0xb0e   :  { %v2275_v63 = vsel %vm773_vm2, %v4228_v39, -inf }
 0xb0f   :  { %2276 = vmax.xlane.f32.xlu1 %v2275_v63 }
 0xb3b   :  { %v2135_v42 = vpop.f32.mrf.mxu1 }
 0xb3c   :  { %v2236_v3 = vmul.f32 0.35355338, %v2135_v42 }
 0xb3e   :  { %v4232_v43 = vadd.f32 %v3472_v10, %v2236_v3 }
 0xb40   :  { %v2284_v20 = vsel %vm773_vm2, %v4232_v43, -inf }
 0xb41   :  { %2285 = vmax.xlane.f32.xlu1 %v2284_v20 }
 0xb43   :  { %v2138_v46 = vpop.f32.mrf.mxu1 }
 0xb44   :  { %v2237_v53 = vmul.f32 0.35355338, %v2138_v46 }
 0xb46   :  { %v4238_v60 = vadd.f32 %v3472_v10, %v2237_v53 }
 0xb48   :  { %v2287_v8 = vsel %vm773_vm2, %v4238_v60, -inf }
 0xb49   :  { %2279 = vmax.xlane.f32.xlu1 %v2278_v40  ;;  %2288 = vmax.xlane.f32.xlu2 %v2287_v8 }
 0xb51   :  { %v2164_v17 = vpop.f32.mrf.mxu2  ;;  %2282 = vmax.xlane.f32.xlu2 %v2281_v16 }
 0xb52   :  { %v2238_v12 = vmul.f32 0.35355338, %v2164_v17 }
 0xb54   :  { %v4254_v5 = vadd.f32 %v3472_v10, %v2238_v12 }
 0xb56   :  { %v2193_v18 = vpop.f32.mrf.mxu0  ;;  %v2290_v7 = vsel %vm773_vm2, %v4254_v5, -inf }
 0xb57   :  { %v2240_v51 = vmul.f32 0.35355338, %v2193_v18 }
 0xb59   :  { %v2167_v56 = vpop.f32.mrf.mxu2  ;;  %v4265_v29 = vadd.f32 %v3472_v10, %v2240_v51 }
 0xb5a   :  { %v2239_v27 = vmul.f32 0.35355338, %v2167_v56 }
 0xb5b   :  { %v2296_v48 = vsel %vm773_vm2, %v4265_v29, -inf }
 0xb5c   :  { %v4248_v22 = vadd.f32 %v3472_v10, %v2239_v27 }
 0xb5e   :  { %v2196_v4 = vpop.f32.mrf.mxu0  ;;  %v2293_v24 = vsel %vm773_vm2, %v4248_v22, -inf }
 0xb5f   :  { %v2241_v37 = vmul.f32 0.35355338, %v2196_v4  ;;  %2294 = vmax.xlane.f32.xlu2 %v2293_v24 }
 0xb61   :  { %v4252_v15 = vadd.f32 %v3472_v10, %v2241_v37  ;;  %v2222_v47 = vpop.f32.mrf.mxu3 }
 0xb62   :  { %v2242_v45 = vmul.f32 0.35355338, %v2222_v47 }
 0xb63   :  { %v2299_v50 = vsel %vm773_vm2, %v4252_v15, -inf }
 0xb64   :  { %2300 = vmax.xlane.f32.xlu1 %v2299_v50  ;;  %v4258_v28 = vadd.f32 %v3472_v10, %v2242_v45 }
 0xb65   :  { %v2268_v6 = vpop.xlane.xlu0 %2267 }
 0xb66   :  { %v2310_v58 = vsub.f32 %v4208_v36, %v2268_v6  ;;  %v2302_v9 = vsel %vm773_vm2, %v4258_v28, -inf }
 0xb67   :  { %2291 = vmax.xlane.f32.xlu2 %v2290_v7 }
 0xb68   :  { %v2328_v32 = vmul.f32 1.442695, %v2310_v58 }
 0xb69   :  { %v2225_v13 = vpop.f32.mrf.mxu3 }
 0xb6a   :  { %3391 = vpow2.f32 %v2328_v32  ;;  %v2243_v62 = vmul.f32 0.35355338, %v2225_v13  ;;  %v2265_v41 = vpop.xlane.xlu1 %2264 }
 0xb6b   :  { %v2309_v38 = vsub.f32 %v4212_v30, %v2265_v41 }
 0xb6c   :  { %2303 = vmax.xlane.f32.xlu1 %v2302_v9  ;;  %v4268_v52 = vadd.f32 %v3472_v10, %v2243_v62 }
 0xb6d   :  { %v2326_v36 = vmul.f32 1.442695, %v2309_v38  ;;  %v2271_v3 = vpop.xlane.xlu2 %2270 }
 0xb6e   :  { %v2305_v63 = vsel %vm773_vm2, %v4268_v52, -inf  ;;  %v2311_v46 = vsub.f32 %v4216_v33, %v2271_v3 }
 0xb6f   :  { %3393 = vpow2.f32 %v2326_v36  ;;  %2306 = vmax.xlane.f32.xlu0 %v2305_v63  ;;  %2297 = vmax.xlane.f32.xlu2 %v2296_v48 }
 0xb70   :  { %v4274_v42 = vpop.eup %3391  ;;  %v2330_v21 = vmul.f32 1.442695, %v2311_v46 }
 0xb71   :  { %v2362_v30 = vsel %vm773_vm2, %v4274_v42, 0.0 }
 0xb72   :  { %v2262_v44 = vpop.xlane.xlu1 %2261 }
 0xb73   :  { %v2308_v20 = vsub.f32 %v4218_v34, %v2262_v44 }
 0xb74   :  { %2363 = vadd.xlane.f32.xlu1 %v2362_v30 }
 0xb75   :  { %v4279_v10 = vpop.eup %3393  ;;  %v2324_v53 = vmul.f32 1.442695, %v2308_v20 }
 0xb76   :  { %v2359_v55 = vsel %vm773_vm2, %v4279_v10, 0.0 }
 0xb77   :  { %3395 = vpow2.f32 %v2324_v53  ;;  %2360 = vadd.xlane.f32.xlu2 %v2359_v55 }
 0xb78   :  { %3397 = vpow2.f32 %v2330_v21 }
 0xb7a   :  { %v2274_v40 = vpop.xlane.xlu1 %2273 }
 0xb7b   :  { %v2312_v34 = vsub.f32 %v4224_v35, %v2274_v40 }
 0xb7d   :  { %v4284_v8 = vpop.eup %3395  ;;  %v2332_v17 = vmul.f32 1.442695, %v2312_v34 }
 0xb7e   :  { %v2356_v16 = vsel %vm773_vm2, %v4284_v8, 0.0  ;;  %v4289_v33 = vpop.eup %3397 }
 0xb7f   :  { %2357 = vadd.xlane.f32.xlu0 %v2356_v16  ;;  %3399 = vpow2.f32 %v2332_v17  ;;  %v2365_v12 = vsel %vm773_vm2, %v4289_v33, 0.0 }
 0xb82   :  { %v2277_v18 = vpop.xlane.xlu1 %2276 }
 0xb83   :  { %v2313_v56 = vsub.f32 %v4228_v39, %v2277_v18 }
 0xb85   :  { %v2334_v27 = vmul.f32 1.442695, %v2313_v56  ;;  %v4294_v4 = vpop.eup %3399 }
 0xb86   :  { %v2368_v24 = vsel %vm773_vm2, %v4294_v4, 0.0 }
 0xb87   :  { %3401 = vpow2.f32 %v2334_v27  ;;  %2366 = vadd.xlane.f32.xlu0 %v2365_v12 }
 0xb8d   :  { %v4296_v35 = vpop.eup %3401 }
 0xb8e   :  { %v2371_v37 = vsel %vm773_vm2, %v4296_v35, 0.0 }
 0xb8f   :  { %2369 = vadd.xlane.f32.xlu0 %v2368_v24  ;;  %2372 = vadd.xlane.f32.xlu2 %v2371_v37 }
 0xbb4   :  { %v2286_v39 = vpop.xlane.xlu1 %2285 }
 0xbb5   :  { %v2316_v51 = vsub.f32 %v4232_v43, %v2286_v39 }
 0xbb7   :  { %v2340_v32 = vmul.f32 1.442695, %v2316_v51 }
 0xbbc   :  { %v2289_v47 = vpop.xlane.xlu2 %2288  ;;  %v2280_v45 = vpop.xlane.xlu1 %2279 }
 0xbbd   :  { %v2317_v50 = vsub.f32 %v4238_v60, %v2289_v47  ;;  %v2314_v6 = vsub.f32 %v4236_v23, %v2280_v45 }
 0xbbf   :  { %v2342_v58 = vmul.f32 1.442695, %v2317_v50  ;;  %v2336_v7 = vmul.f32 1.442695, %v2314_v6 }
 0xbc1   :  { %3403 = vpow2.f32 %v2342_v58 }
 0xbc2   :  { %3405 = vpow2.f32 %v2336_v7 }
 0xbc3   :  { %3407 = vpow2.f32 %v2340_v32 }
 0xbc4   :  { %v2283_v13 = vpop.xlane.xlu2 %2282 }
 0xbc5   :  { %v2315_v9 = vsub.f32 %v4244_v11, %v2283_v13 }
 0xbc7   :  { %v4306_v62 = vpop.eup %3403  ;;  %v2338_v41 = vmul.f32 1.442695, %v2315_v9 }
 0xbc8   :  { %v4308_v38 = vpop.eup %3405  ;;  %v2383_v60 = vsel %vm773_vm2, %v4306_v62, 0.0 }
 0xbc9   :  { %3409 = vpow2.f32 %v2338_v41  ;;  %2384 = vadd.xlane.f32.xlu2 %v2383_v60  ;;  %v2374_v43 = vsel %vm773_vm2, %v4308_v38, 0.0  ;;  %v4314_v23 = vpop.eup %3407 }
 0xbca   :  { %2375 = vadd.xlane.f32.xlu1 %v2374_v43  ;;  %v2380_v11 = vsel %vm773_vm2, %v4314_v23, 0.0 }
 0xbcf   :  { %v4316_v36 = vpop.eup %3409 }
 0xbd0   :  { %v2377_v63 = vsel %vm773_vm2, %v4316_v36, 0.0 }
 0xbd1   :  { %2381 = vadd.xlane.f32.xlu2 %v2380_v11 }
 0xbd2   :  { %2378 = vadd.xlane.f32.xlu1 %v2377_v63  ;;  %v2295_v48 = vpop.xlane.xlu2 %2294 }
 0xbd3   :  { %v2319_v3 = vsub.f32 %v4248_v22, %v2295_v48 }
 0xbd5   :  { %v2346_v44 = vmul.f32 1.442695, %v2319_v3 }
 0xbd7   :  { %3411 = vpow2.f32 %v2346_v44  ;;  %v2301_v20 = vpop.xlane.xlu1 %2300 }
 0xbd8   :  { %v2321_v30 = vsub.f32 %v4252_v15, %v2301_v20 }
 0xbda   :  { %v2350_v46 = vmul.f32 1.442695, %v2321_v30  ;;  %v2292_v53 = vpop.xlane.xlu2 %2291 }
 0xbdb   :  { %v2318_v55 = vsub.f32 %v4254_v5, %v2292_v53 }
 0xbdc   :  { %3413 = vpow2.f32 %v2350_v46 }
 0xbdd   :  { %v4325_v21 = vpop.eup %3411  ;;  %v2344_v40 = vmul.f32 1.442695, %v2318_v55 }
 0xbde   :  { %v2389_v34 = vsel %vm773_vm2, %v4325_v21, 0.0 }
 0xbdf   :  { %3415 = vpow2.f32 %v2344_v40  ;;  %2390 = vadd.xlane.f32.xlu0 %v2389_v34  ;;  %v2304_v16 = vpop.xlane.xlu1 %2303 }
 0xbe0   :  { %v2322_v22 = vsub.f32 %v4258_v28, %v2304_v16 }
 0xbe2   :  { %v2352_v17 = vmul.f32 1.442695, %v2322_v22  ;;  %v2307_v18 = vpop.xlane.xlu0 %2306  ;;  %v2298_v56 = vpop.xlane.xlu2 %2297 }
 0xbe3   :  { %v4330_v15 = vpop.eup %3413  ;;  %v2323_v27 = vsub.f32 %v4268_v52, %v2307_v18  ;;  %v2320_v5 = vsub.f32 %v4265_v29, %v2298_v56 }
 0xbe4   :  { %3417 = vpow2.f32 %v2352_v17  ;;  %v2395_v28 = vsel %vm773_vm2, %v4330_v15, 0.0 }
 0xbe5   :  { %v4334_v12 = vpop.eup %3415  ;;  %v2354_v24 = vmul.f32 1.442695, %v2323_v27  ;;  %v2348_v37 = vmul.f32 1.442695, %v2320_v5 }
 0xbe6   :  { %v2386_v39 = vsel %vm773_vm2, %v4334_v12, 0.0 }
 0xbe7   :  { %3419 = vpow2.f32 %v2354_v24  ;;  %2387 = vadd.xlane.f32.xlu1 %v2386_v39  ;;  %2396 = vadd.xlane.f32.xlu0 %v2395_v28  ;;  %v2364_v9 = vpop.xlane.xlu1 %2363 }
 0xbe8   :  { %3421 = vpow2.f32 %v2348_v37 }
 0xbea   :  { %v2361_v47 = vpop.xlane.xlu2 %2360  ;;  %v4340_v45 = vpop.eup %3417 }
 0xbeb   :  { %3423 = vrcp.f32 %v2361_v47  ;;  %v2398_v6 = vsel %vm773_vm2, %v4340_v45, 0.0 }
 0xbed   :  { %v4342_v29 = vpop.eup %3419 }
 0xbee   :  { %v4344_v52 = vpop.eup %3421  ;;  %v2401_v50 = vsel %vm773_vm2, %v4342_v29, 0.0 }
 0xbef   :  { %2402 = vadd.xlane.f32.xlu2 %v2401_v50  ;;  %v2392_v51 = vsel %vm773_vm2, %v4344_v52, 0.0  ;;  %2399 = vadd.xlane.f32.xlu0 %v2398_v6 }
 0xbf0   :  { %2393 = vadd.xlane.f32.xlu1 %v2392_v51 }
 0xbf1   :  { %v3424_v58 = vpop.eup %3423 }
 0xbf2   :  { %v2421_v7 = vmul.f32 %v3424_v58, %v4279_v10  ;;  %v2358_v32 = vpop.xlane.xlu0 %2357 }
 0xbf3   :  { %3425 = vrcp.f32 %v2358_v32 }
 0xbf4   :  { %3219 = vmatpush.xpose.msk.msra.mxu1 %vm773_vm2, %v2421_v7 }
 0xbf9   :  { %v3426_v13 = vpop.eup %3425 }
 0xbfa   :  { %v2367_v41 = vpop.xlane.xlu0 %2366  ;;  %v2420_v60 = vmul.f32 %v3426_v13, %v4284_v8 }
 0xbfb   :  { %3427 = vrcp.f32 %v2367_v41 }
 0xbfc   :  { %3220 = vmatpush.xpose.msk.msra.mxu1 %vm773_vm2, %v2420_v60  ;;  %3429 = vrcp.f32 %v2364_v9  ;;  %v3302_v9 = vld [vmem:[#allocation7 + $0x1] ss:$0 sm:$0xff] }
 0xbff   :  { %3221 = vmatmul.msk.f32.vlgmr.msra.gmra.mxu1 %vm773_vm2, %v4176_v59 }
 0xc01   :  { %v3428_v43 = vpop.eup %3427 }
 0xc02   :  { %v2423_v11 = vmul.f32 %v3428_v43, %v4289_v33  ;;  %v2373_v10 = vpop.xlane.xlu2 %2372  ;;  %v3430_v63 = vpop.eup %3429 }
 0xc03   :  { %v2370_v48 = vpop.xlane.xlu0 %2369  ;;  %3431 = vrcp.f32 %v2373_v10  ;;  %v2422_v3 = vmul.f32 %v3430_v63, %v4274_v42 }
 0xc04   :  { %3222 = vmatpush.xpose.msk.msrb.mxu2 %vm773_vm2, %v2423_v11  ;;  %3433 = vrcp.f32 %v2370_v48 }
 0xc08   :  { %3223 = vmatpush.xpose.msk.msrb.mxu2 %vm773_vm2, %v2422_v3 }
 0xc09   :  { %v3432_v8 = vpop.eup %3431 }
 0xc0a   :  { %v2425_v44 = vmul.f32 %v3432_v8, %v4296_v35  ;;  %v3434_v59 = vpop.eup %3433 }
 0xc0b   :  { %3224 = vmatmul.msk.f32.vlgmr.msrb.gmra.mxu2 %vm773_vm2, %v4178_v49  ;;  %v2424_v33 = vmul.f32 %v3434_v59, %v4294_v4 }
 0xc0c   :  { %3225 = vmatpush.xpose.msk.msrb.mxu0 %vm773_vm2, %v2425_v44 }
 0xc10   :  { %3226 = vmatpush.xpose.msk.msrb.mxu0 %vm773_vm2, %v2424_v33 }
 0xc13   :  { %3227 = vmatmul.msk.f32.vlgmr.msrb.gmra.mxu0 %vm773_vm2, %v4180_v14 }
 0xc3c   :  { %v2385_v20 = vpop.xlane.xlu2 %2384 }
 0xc3d   :  { %3435 = vrcp.f32 %v2385_v20  ;;  %v2376_v42 = vpop.xlane.xlu1 %2375 }
 0xc43   :  { %v3436_v30 = vpop.eup %3435 }
 0xc44   :  { %v2429_v46 = vmul.f32 %v3436_v30, %v4306_v62  ;;  %v2382_v35 = vpop.xlane.xlu2 %2381 }
 0xc45   :  { %3437 = vrcp.f32 %v2382_v35  ;;  %v2379_v53 = vpop.xlane.xlu1 %2378 }
 0xc46   :  { %3439 = vrcp.f32 %v2379_v53  ;;  %3231 = vmatpush.xpose.msk.msra.mxu2 %vm773_vm2, %v2429_v46 }
 0xc47   :  { %3441 = vrcp.f32 %v2376_v42 }
 0xc4b   :  { %v3438_v49 = vpop.eup %3437 }
 0xc4c   :  { %v3440_v4 = vpop.eup %3439  ;;  %v2428_v55 = vmul.f32 %v3438_v49, %v4314_v23 }
 0xc4d   :  { %v2427_v40 = vmul.f32 %v3440_v4, %v4316_v36  ;;  %v3442_v14 = vpop.eup %3441 }
 0xc4e   :  { %3232 = vmatpush.xpose.msk.msra.mxu2 %vm773_vm2, %v2428_v55  ;;  %v2426_v62 = vmul.f32 %v3442_v14, %v4308_v38 }
 0xc4f   :  { %3228 = vmatpush.xpose.msk.msrb.mxu1 %vm773_vm2, %v2427_v40 }
 0xc51   :  { %3233 = vmatmul.msk.f32.vlgmr.msra.gmra.mxu2 %vm773_vm2, %v4184_v19 }
 0xc52   :  { %v2391_v34 = vpop.xlane.xlu0 %2390 }
 0xc53   :  { %3443 = vrcp.f32 %v2391_v34  ;;  %3229 = vmatpush.xpose.msk.msrb.mxu1 %vm773_vm2, %v2426_v62 }
 0xc56   :  { %3230 = vmatmul.msk.f32.vlgmr.msrb.gmra.mxu1 %vm773_vm2, %v4182_v54 }
 0xc59   :  { %v3444_v23 = vpop.eup %3443 }
 0xc5a   :  { %v2431_v36 = vmul.f32 %v3444_v23, %v4325_v21  ;;  %v2397_v16 = vpop.xlane.xlu0 %2396  ;;  %v2388_v22 = vpop.xlane.xlu1 %2387 }
 0xc5b   :  { %3445 = vrcp.f32 %v2397_v16 }
 0xc5c   :  { %3447 = vrcp.f32 %v2388_v22  ;;  %3234 = vmatpush.xpose.msk.msra.mxu3 %vm773_vm2, %v2431_v36 }
 0xc61   :  { %v3446_v17 = vpop.eup %3445 }
 0xc62   :  { %v3448_v19 = vpop.eup %3447  ;;  %v2433_v38 = vmul.f32 %v3446_v17, %v4330_v15  ;;  %v2403_v18 = vpop.xlane.xlu2 %2402 }
 0xc63   :  { %v2400_v56 = vpop.xlane.xlu0 %2399  ;;  %3449 = vrcp.f32 %v2403_v18  ;;  %v2394_v27 = vpop.xlane.xlu1 %2393  ;;  %v2430_v5 = vmul.f32 %v3448_v19, %v4334_v12  ;;  %v3255_v18 = vld [vmem:[%s4560_s8 + $0x38] sm:$0xff] }
 0xc64   :  { %3451 = vrcp.f32 %v2400_v56  ;;  %3237 = vmatpush.xpose.msk.msra.mxu0 %vm773_vm2, %v2433_v38  ;;  %v3254_v56 = vld [vmem:[%s4560_s8 + $0x30] sm:$0xff] }
 0xc65   :  { %3453 = vrcp.f32 %v2394_v27  ;;  %3235 = vmatpush.xpose.msk.msra.mxu3 %vm773_vm2, %v2430_v5  ;;  %v3253_v27 = vld [vmem:[%s4560_s8 + $0x28] sm:$0xff]  ;;  %v3252_v5 = vld [vmem:[%s4560_s8 + $0x20] sm:$0xff]  ;;  %s3123_s8 = sshll.u32 %s4566_s14, 4  ;;  %s3124_s8 = int_to_ptr.hbm [resolvable:$true] %s3123_s8 }
 0xc68   :  { %3236 = vmatmul.msk.f32.vlgmr.msra.gmra.mxu3 %vm773_vm2, %v4187_v61 }
 0xc69   :  { %v3450_v54 = vpop.eup %3449  ;;  %2927 = vmatpush.msrb.mxu3 %v3255_v18 }
 0xc6a   :  { %v3452_v21 = vpop.eup %3451  ;;  %v2435_v24 = vmul.f32 %v3450_v54, %v4342_v29 }
 0xc6b   :  { %v3454_v15 = vpop.eup %3453  ;;  %v2434_v12 = vmul.f32 %v3452_v21, %v4340_v45  ;;  %v3246_v45 = vld [vmem:[%s4556_s4 + $0x38] sm:$0xff]  ;;  %2928 = vmatpush.msrb.mxu3 %v3254_v56 }
 0xc6c   :  { %v2432_v37 = vmul.f32 %v3454_v15, %v4344_v52  ;;  %3240 = vmatpush.xpose.msk.msra.mxu1 %vm773_vm2, %v2435_v24  ;;  %2766 = vmatpush.msrb.mxu2 %v3246_v45  ;;  %v3243_v52 = vld [vmem:[%s4556_s4 + $0x20] sm:$0xff] }
 0xc6d   :  { %2929 = vmatpush.msrb.mxu3 %v3253_v27  ;;  %v3262_v27 = vld [vmem:[%s4562_s10 + $0x48] sm:$0xff] }
 0xc6e   :  { %3238 = vmatpush.xpose.msk.msra.mxu0 %vm773_vm2, %v2432_v37 }
 0xc6f   :  { %2930 = vmatpush.msrb.mxu3 %v3252_v5  ;;  %v3261_v5 = vld [vmem:[%s4562_s10 + $0x40] sm:$0xff] }
 0xc70   :  { %3241 = vmatpush.xpose.msk.msra.mxu1 %vm773_vm2, %v2434_v12 }
 0xc71   :  { %3239 = vmatmul.msk.f32.vlgmr.msra.gmra.mxu0 %vm773_vm2, %v4191_v1  ;;  %v3245_v1 = vld [vmem:[%s4556_s4 + $0x30] sm:$0xff] }
 0xc72   :  { %2767 = vmatpush.msrb.mxu2 %v3245_v1 }
 0xc73   :  { %3242 = vmatmul.msk.f32.vlgmr.msra.gmra.mxu1 %vm773_vm2, %v4195_v0  ;;  %v3244_v0 = vld [vmem:[%s4556_s4 + $0x28] sm:$0xff] }
 0xc74   :  { %2768 = vmatpush.msrb.mxu2 %v3244_v0 }
 0xc76   :  { %2769 = vmatpush.msrb.mxu2 %v3243_v52  ;;  %v4457_v52 = vld [vmem:[%s4558_s6 + $0x1] ss:$0 sm:$0xff] }
 0xc7c   :  { %v2462_v61 = vpop.f32.mrf.mxu1 }
 0xc7d   :  { %2668 = vxpose.xlu2.b32.start [1/4] (short) (narrow) %v2462_v61, 16 }
 0xc8e   :  { %v2491_v39 = vpop.f32.mrf.mxu2 }
 0xc8f   :  { %2669 = vxpose.xlu2.b32.cont [2/4] (short) (narrow) %v2491_v39, 16 }
 0xc90   :  { %v2520_v28 = vpop.f32.mrf.mxu0 }
 0xc97   :  { %2670 = vxpose.xlu2.b32.cont [3/4] (short) (narrow) %v2520_v28, 16 }
 0xcd3   :  { %v2549_v47 = vpop.f32.mrf.mxu1 }
 0xcd4   :  { %2671 = vxpose.xlu2.b32.end [4/4] (short) (narrow) %v2549_v47, 16  ;;  %v2578_v29 = vpop.f32.mrf.mxu2 }
 0xcd5   :  { %2700 = vxpose.xlu1.b32.start [1/4] (short) (narrow) %v2578_v29, 16 }
 0xceb   :  { %v2607_v50 = vpop.f32.mrf.mxu3 }
 0xcec   :  { %2701 = vxpose.xlu1.b32.cont [2/4] (short) (narrow) %v2607_v50, 16 }
 0xcee   :  { %v2636_v6 = vpop.f32.mrf.mxu0 }
 0xcf0   :  { %v2665_v51 = vpop.f32.mrf.mxu1 }
 0xcf4   :  { %2702 = vxpose.xlu1.b32.cont [3/4] (short) (narrow) %v2636_v6, 16 }
 0xcfc   :  { %2703 = vxpose.xlu1.b32.end [4/4] (short) (narrow) %v2665_v51, 16 }
 0xd55   :  { %v2684_v58 = vpop.trf.xlu2 }
 0xd56   :  { %3247 = vmatmul.msk.f32.vlgmr.msrb.gmra.mxu2 %vm140_vm0, %v2684_v58  ;;  %v3304_v58 = vld [vmem:[#allocation8 + $0x1] ss:$0 sm:$0xff] }
 0xd5d   :  { %v2685_v7 = vpop.trf.xlu2 }
 0xd5e   :  { %3248 = vmatmul.msk.f32.gmra.mxu2 %vm140_vm0, %v2685_v7 }
 0xd88   :  { %v2716_v32 = vpop.trf.xlu1 }
 0xd89   :  { %3249 = vmatmul.msk.f32.gmra.mxu2 %vm140_vm0, %v2716_v32 }
 0xd90   :  { %v2717_v13 = vpop.trf.xlu1 }
 0xd91   :  { %3250 = vmatmul.msk.f32.gmra.mxu2 %vm140_vm0, %v2717_v13 }
 0xdd9   :  { %v2771_v41 = vpop.f32.mrf.mxu2 }
 0xdda   :  { %v2772_v60 = vadd.f32 %v3302_v9, %v2771_v41 }
 0xddc   :  { %v2783_v43 = vadd.f32 %v2772_v60, %v4152_v57 }
 0xdde   :  { %v2787_v11 = vsel %vm140_vm0, %v2783_v43, 0.0 }
 0xddf   :  { %2788 = vadd.xlane.f32.xlu0 %v2787_v11 }
 0xde1   :  { %v2774_v10 = vpop.f32.mrf.mxu2 }
 0xde2   :  { %v2775_v63 = vadd.f32 %v3302_v9, %v2774_v10 }
 0xde4   :  { %v2784_v48 = vadd.f32 %v2775_v63, %v4157_v2 }
 0xde6   :  { %v2790_v3 = vsel %vm140_vm0, %v2784_v48, 0.0 }
 0xde7   :  { %2791 = vadd.xlane.f32.xlu0 %v2790_v3 }
 0xe0c   :  { %v2777_v8 = vpop.f32.mrf.mxu2 }
 0xe0d   :  { %v2778_v44 = vadd.f32 %v3302_v9, %v2777_v8  ;;  %v3268_v8 = vld [vmem:[%s4562_s10 + $0x78] sm:$0xff] }
 0xe0e   :  { %2982 = vmatpush.msrb.mxu0 %v3268_v8 }
 0xe0f   :  { %v2785_v59 = vadd.f32 %v2778_v44, %v4164_v26  ;;  %v3267_v44 = vld [vmem:[%s4562_s10 + $0x70] sm:$0xff] }
 0xe10   :  { %2983 = vmatpush.msrb.mxu0 %v3267_v44 }
 0xe11   :  { %v2793_v33 = vsel %vm140_vm0, %v2785_v59, 0.0 }
 0xe12   :  { %2794 = vadd.xlane.f32.xlu0 %v2793_v33 }
 0xe14   :  { %v2780_v20 = vpop.f32.mrf.mxu2 }
 0xe15   :  { %v2781_v42 = vadd.f32 %v3302_v9, %v2780_v20 }
 0xe17   :  { %v2786_v57 = vadd.f32 %v2781_v42, %v4169_v31  ;;  %v3265_v42 = vld [vmem:[%s4562_s10 + $0x60] sm:$0xff] }
 0xe19   :  { %v2796_v30 = vsel %vm140_vm0, %v2786_v57, 0.0 }
 0xe1a   :  { %2797 = vadd.xlane.f32.xlu0 %v2796_v30 }
 0xe52   :  { %v2789_v46 = vpop.xlane.xlu0 %2788 }
 0xe53   :  { %v2799_v2 = vmul.f32 %v2789_v46, %v4020_v25  ;;  %v3264_v46 = vld [vmem:[%s4562_s10 + $0x58] sm:$0xff] }
 0xe55   :  { %v2803_v35 = vsub.f32 %v2783_v43, %v2799_v2 }
 0xe57   :  { %v2807_v53 = vmul.f32 %v2803_v35, %v2803_v35 }
 0xe59   :  { %v2811_v49 = vsel %vm140_vm0, %v2807_v53, 0.0 }
 0xe5a   :  { %v2792_v4 = vpop.xlane.xlu0 %2791  ;;  %2812 = vadd.xlane.f32.xlu0 %v2811_v49 }
 0xe5b   :  { %v2800_v26 = vmul.f32 %v2792_v4, %v4020_v25 }
 0xe5d   :  { %v2804_v55 = vsub.f32 %v2784_v48, %v2800_v26 }
 0xe5f   :  { %v2808_v40 = vmul.f32 %v2804_v55, %v2804_v55 }
 0xe61   :  { %v2814_v14 = vsel %vm140_vm0, %v2808_v40, 0.0 }
 0xe62   :  { %2815 = vadd.xlane.f32.xlu0 %v2814_v14 }
 0xe85   :  { %v2795_v31 = vpop.xlane.xlu0 %2794 }
 0xe86   :  { %v2801_v62 = vmul.f32 %v2795_v31, %v4020_v25 }
 0xe88   :  { %v4429_v34 = vsub.f32 %v2785_v59, %v2801_v62  ;;  %v3266_v59 = vld [vmem:[%s4562_s10 + $0x68] sm:$0xff] }
 0xe89   :  { %2984 = vmatpush.msrb.mxu0 %v3266_v59 }
 0xe8a   :  { %v2809_v23 = vmul.f32 %v4429_v34, %v4429_v34 }
 0xe8b   :  { %2985 = vmatpush.msrb.mxu0 %v3265_v42 }
 0xe8c   :  { %v2817_v36 = vsel %vm140_vm0, %v2809_v23, 0.0 }
 0xe8d   :  { %2818 = vadd.xlane.f32.xlu0 %v2817_v36  ;;  %v2798_v16 = vpop.xlane.xlu0 %2797  ;;  %2986 = vmatpush.msrb.mxu0 %v3264_v46 }
 0xe8e   :  { %v2802_v22 = vmul.f32 %v2798_v16, %v4020_v25 }
 0xe90   :  { %v4435_v17 = vsub.f32 %v2786_v57, %v2802_v22 }
 0xe92   :  { %v2810_v19 = vmul.f32 %v4435_v17, %v4435_v17 }
 0xe94   :  { %v2820_v38 = vsel %vm140_vm0, %v2810_v19, 0.0 }
 0xe95   :  { %2821 = vadd.xlane.f32.xlu0 %v2820_v38 }
 0xecd   :  { %v2813_v54 = vpop.xlane.xlu0 %2812 }
 0xece   :  { %v2823_v21 = vmul.f32 %v2813_v54, %v4020_v25 }
 0xed0   :  { %v2827_v24 = vadd.f32 1e-05, %v2823_v21 }
 0xed2   :  { %3455 = vrsqrt.f32 %v2827_v24  ;;  %vm2837_vm2 = vweird.f32 %v2827_v24 }
 0xed5   :  { %v2816_v15 = vpop.xlane.xlu0 %2815 }
 0xed6   :  { %v2824_v37 = vmul.f32 %v2816_v15, %v4020_v25 }
 0xed8   :  { %v3456_v12 = vpop.eup %3455  ;;  %v2828_v61 = vadd.f32 1e-05, %v2824_v37 }
 0xed9   :  { %v2832_v39 = vmul.f32 %v3456_v12, %v2827_v24  ;;  %vm2838_vm1 = vweird.f32 %v3456_v12 }
 0xeda   :  { %3457 = vrsqrt.f32 %v2828_v61  ;;  %vm2839_vm4 = vmor %vm2837_vm2, %vm2838_vm1  ;;  %vm2847_vm6 = vweird.f32 %v2828_v61 }
 0xedb   :  { %v2833_v28 = vmul.f32 %v3456_v12, %v2832_v39 }
 0xedd   :  { %v2834_v47 = vmul.f32 0.5, %v2833_v28 }
 0xedf   :  { %v2835_v29 = vsub.f32 1.5, %v2834_v47 }
 0xee0   :  { %v3458_v45 = vpop.eup %3457 }
 0xee1   :  { %v2836_v1 = vmul.f32 %v3456_v12, %v2835_v29  ;;  %v2842_v0 = vmul.f32 %v3458_v45, %v2828_v61  ;;  %vm2848_vm5 = vweird.f32 %v3458_v45 }
 0xee2   :  { %vm2849_vm7 = vmor %vm2847_vm6, %vm2848_vm5 }
 0xee3   :  { %v2840_v50 = vsel %vm2839_vm4, %v3456_v12, %v2836_v1  ;;  %v2843_v6 = vmul.f32 %v3458_v45, %v2842_v0  ;;  %v3306_v1 = vld [vmem:[%s4563_s11 + $0x1] ss:$0 sm:$0xff] }
 0xee4   :  { %v2871_v51 = vmul.f32 %v2840_v50, %v2803_v35 }
 0xee5   :  { %v2844_v7 = vmul.f32 0.5, %v2843_v6 }
 0xee6   :  { %v2880_v32 = vmul.f32 %v4457_v52, %v2871_v51 }
 0xee7   :  { %v2845_v13 = vsub.f32 1.5, %v2844_v7 }
 0xee8   :  { %v4460_v9 = vadd.f32 %v3304_v58, %v2880_v32 }
 0xee9   :  { %v2846_v41 = vmul.f32 %v3458_v45, %v2845_v13 }
 0xeea   :  { %3257 = vmatmul.msk.f32.vlgmr.msrb.gmra.mxu3 %vm140_vm0, %v4460_v9 }
 0xeeb   :  { %v2850_v60 = vsel %vm2849_vm7, %v3458_v45, %v2846_v41 }
 0xeec   :  { %v2872_v43 = vmul.f32 %v2850_v60, %v2804_v55 }
 0xeee   :  { %v2881_v11 = vmul.f32 %v4457_v52, %v2872_v43 }
 0xef0   :  { %v4465_v10 = vadd.f32 %v3304_v58, %v2881_v11 }
 0xef2   :  { %3258 = vmatmul.msk.f32.gmra.mxu3 %vm140_vm0, %v4465_v10 }
 0xf00   :  { %v2819_v63 = vpop.xlane.xlu0 %2818 }
 0xf01   :  { %v2825_v48 = vmul.f32 %v2819_v63, %v4020_v25 }
 0xf03   :  { %v2829_v3 = vadd.f32 1e-05, %v2825_v48 }
 0xf05   :  { %3459 = vrsqrt.f32 %v2829_v3  ;;  %vm2857_vm9 = vweird.f32 %v2829_v3 }
 0xf08   :  { %v2822_v33 = vpop.xlane.xlu0 %2821 }
 0xf09   :  { %v2826_v20 = vmul.f32 %v2822_v33, %v4020_v25 }
 0xf0b   :  { %v3460_v57 = vpop.eup %3459  ;;  %v2830_v30 = vadd.f32 1e-05, %v2826_v20 }
 0xf0c   :  { %v2852_v2 = vmul.f32 %v3460_v57, %v2829_v3  ;;  %vm2858_vm8 = vweird.f32 %v3460_v57 }
 0xf0d   :  { %3461 = vrsqrt.f32 %v2830_v30  ;;  %vm2859_vm10 = vmor %vm2857_vm9, %vm2858_vm8  ;;  %vm2867_vm12 = vweird.f32 %v2830_v30 }
 0xf0e   :  { %v2853_v35 = vmul.f32 %v3460_v57, %v2852_v2 }
 0xf10   :  { %v2854_v53 = vmul.f32 0.5, %v2853_v35 }
 0xf12   :  { %v2855_v49 = vsub.f32 1.5, %v2854_v53 }
 0xf13   :  { %v3462_v4 = vpop.eup %3461 }
 0xf14   :  { %v2856_v26 = vmul.f32 %v3460_v57, %v2855_v49  ;;  %v2862_v55 = vmul.f32 %v3462_v4, %v2830_v30  ;;  %vm2868_vm11 = vweird.f32 %v3462_v4 }
 0xf15   :  { %vm2869_vm13 = vmor %vm2867_vm12, %vm2868_vm11 }
 0xf16   :  { %v2860_v40 = vsel %vm2859_vm10, %v3460_v57, %v2856_v26  ;;  %v2863_v14 = vmul.f32 %v3462_v4, %v2862_v55 }
 0xf17   :  { %v2873_v31 = vmul.f32 %v2860_v40, %v4429_v34  ;;  %v3263_v34 = vld [vmem:[%s4562_s10 + $0x50] sm:$0xff] }
 0xf18   :  { %v2864_v62 = vmul.f32 0.5, %v2863_v14  ;;  %2987 = vmatpush.msrb.mxu0 %v3263_v34 }
 0xf19   :  { %v2882_v23 = vmul.f32 %v4457_v52, %v2873_v31 }
 0xf1a   :  { %v2865_v36 = vsub.f32 1.5, %v2864_v62  ;;  %2988 = vmatpush.msrb.mxu0 %v3262_v27 }
 0xf1b   :  { %v2891_v16 = vadd.f32 %v3304_v58, %v2882_v23 }
 0xf1c   :  { %v2866_v22 = vmul.f32 %v3462_v4, %v2865_v36  ;;  %2989 = vmatpush.msrb.mxu0 %v3261_v5 }
 0xf1d   :  { %3259 = vmatmul.msk.f32.gmra.mxu3 %vm140_vm0, %v2891_v16 }
 0xf1e   :  { %v2870_v19 = vsel %vm2869_vm13, %v3462_v4, %v2866_v22 }
 0xf1f   :  { %v2874_v38 = vmul.f32 %v2870_v19, %v4435_v17  ;;  %v3305_v17 = vld [vmem:[%s4561_s9 + $0x1] ss:$0 sm:$0xff] }
 0xf21   :  { %v2883_v18 = vmul.f32 %v4457_v52, %v2874_v38 }
 0xf23   :  { %v2892_v56 = vadd.f32 %v3304_v58, %v2883_v18 }
 0xf25   :  { %3260 = vmatmul.msk.f32.gmra.mxu3 %vm140_vm0, %v2892_v56 }
 0xf6d   :  { %v2932_v54 = vpop.f32.mrf.mxu3 }
 0xf6e   :  { %v2933_v21 = vadd.f32 %v3305_v17, %v2932_v54  ;;  %v3307_v54 = vld [vmem:[%s4564_s12 + $0x1] ss:$0 sm:$0xff]  ;;  %s3635_s12 = smov [#allocation11]  }
 0xf6f   :  { %s3121_s17 = sshll.u32 %s3635_s12, 4  ;;  %s3122_s17 = int_to_ptr.vmem [resolvable:$true] %s3121_s17 }
 0xf70   :  { %v2944_v24 = vmax.f32 %v2933_v21, 0.0 }
 0xf72   :  { %3270 = vmatmul.msk.f32.vlgmr.msrb.gmra.mxu0 %vm1475_vm3, %v2944_v24 }
 0xf75   :  { %v2935_v15 = vpop.f32.mrf.mxu3 }
 0xf76   :  { %v2936_v37 = vadd.f32 %v3305_v17, %v2935_v15  ;;  %v3308_v15 = vld [vmem:[#allocation10 + $0x1] ss:$0 sm:$0xff] }
 0xf78   :  { %v2945_v12 = vmax.f32 %v2936_v37, 0.0 }
 0xf7a   :  { %3271 = vmatmul.msk.f32.gmra.mxu0 %vm1475_vm3, %v2945_v12 }
 0xfa0   :  { %v2938_v61 = vpop.f32.mrf.mxu3 }
 0xfa1   :  { %v2939_v39 = vadd.f32 %v3305_v17, %v2938_v61 }
 0xfa3   :  { %v2946_v28 = vmax.f32 %v2939_v39, 0.0 }
 0xfa5   :  { %3272 = vmatmul.msk.f32.gmra.mxu0 %vm1475_vm3, %v2946_v28 }
 0xfa8   :  { %v2941_v47 = vpop.f32.mrf.mxu3 }
 0xfa9   :  { %v2942_v29 = vadd.f32 %v3305_v17, %v2941_v47 }
 0xfab   :  { %v2947_v45 = vmax.f32 %v2942_v29, 0.0 }
 0xfad   :  { %3273 = vmatmul.msk.f32.gmra.mxu0 %vm1475_vm3, %v2947_v45 }
 0xfef   :  { %v2991_v0 = vpop.f32.mrf.mxu0 }
 0xff0   :  { %v2992_v52 = vadd.f32 %v3306_v1, %v2991_v0 }
 0xff2   :  { %v3003_v50 = vadd.f32 %v2992_v52, %v4460_v9 }
 0xff4   :  { %v3007_v6 = vsel %vm140_vm0, %v3003_v50, 0.0 }
 0xff5   :  { %3008 = vadd.xlane.f32.xlu2 %v3007_v6 }
 0xff7   :  { %v2994_v51 = vpop.f32.mrf.mxu0 }
 0xff8   :  { %v2995_v58 = vadd.f32 %v3306_v1, %v2994_v51 }
 0xffa   :  { %v3004_v7 = vadd.f32 %v2995_v58, %v4465_v10 }
 0xffc   :  { %v3010_v32 = vsel %vm140_vm0, %v3004_v7, 0.0 }
 0xffd   :  { %3011 = vadd.xlane.f32.xlu0 %v3010_v32 }
0x1022   :  { %v2997_v13 = vpop.f32.mrf.mxu0 }
0x1023   :  { %v2998_v41 = vadd.f32 %v3306_v1, %v2997_v13 }
0x1025   :  { %v3005_v60 = vadd.f32 %v2998_v41, %v2891_v16 }
0x1027   :  { %v3013_v43 = vsel %vm140_vm0, %v3005_v60, 0.0 }
0x1028   :  { %3014 = vadd.xlane.f32.xlu0 %v3013_v43 }
0x102a   :  { %v3000_v11 = vpop.f32.mrf.mxu0 }
0x102b   :  { %v3001_v63 = vadd.f32 %v3306_v1, %v3000_v11 }
0x102d   :  { %v3006_v48 = vadd.f32 %v3001_v63, %v2892_v56 }
0x102f   :  { %v3016_v9 = vsel %vm140_vm0, %v3006_v48, 0.0 }
0x1030   :  { %3017 = vadd.xlane.f32.xlu1 %v3016_v9 }
0x1068   :  { %v3009_v3 = vpop.xlane.xlu2 %3008 }
0x1069   :  { %v3019_v8 = vmul.f32 %v3009_v3, %v4020_v25 }
0x106b   :  { %v3023_v44 = vsub.f32 %v3003_v50, %v3019_v8 }
0x106d   :  { %v3027_v10 = vmul.f32 %v3023_v44, %v3023_v44 }
0x106f   :  { %v3031_v59 = vsel %vm140_vm0, %v3027_v10, 0.0 }
0x1070   :  { %3032 = vadd.xlane.f32.xlu0 %v3031_v59  ;;  %v3012_v33 = vpop.xlane.xlu0 %3011 }
0x1071   :  { %v3020_v20 = vmul.f32 %v3012_v33, %v4020_v25 }
0x1073   :  { %v3024_v42 = vsub.f32 %v3004_v7, %v3020_v20 }
0x1075   :  { %v3028_v57 = vmul.f32 %v3024_v42, %v3024_v42 }
0x1077   :  { %v3034_v30 = vsel %vm140_vm0, %v3028_v57, 0.0 }
0x1078   :  { %3035 = vadd.xlane.f32.xlu0 %v3034_v30 }
0x109b   :  { %v3015_v46 = vpop.xlane.xlu0 %3014 }
0x109c   :  { %v3021_v2 = vmul.f32 %v3015_v46, %v4020_v25 }
0x109e   :  { %v4522_v35 = vsub.f32 %v3005_v60, %v3021_v2 }
0x10a0   :  { %v3029_v53 = vmul.f32 %v4522_v35, %v4522_v35 }
0x10a2   :  { %v3037_v49 = vsel %vm140_vm0, %v3029_v53, 0.0 }
0x10a3   :  { %v3018_v4 = vpop.xlane.xlu1 %3017  ;;  %3038 = vadd.xlane.f32.xlu0 %v3037_v49 }
0x10a4   :  { %v3022_v26 = vmul.f32 %v3018_v4, %v4020_v25 }
0x10a6   :  { %v4528_v55 = vsub.f32 %v3006_v48, %v3022_v26 }
0x10a8   :  { %v3030_v40 = vmul.f32 %v4528_v55, %v4528_v55 }
0x10aa   :  { %v3040_v14 = vsel %vm140_vm0, %v3030_v40, 0.0 }
0x10ab   :  { %3041 = vadd.xlane.f32.xlu0 %v3040_v14 }
0x10e3   :  { %v3033_v31 = vpop.xlane.xlu0 %3032 }
0x10e4   :  { %v3043_v62 = vmul.f32 %v3033_v31, %v4020_v25 }
0x10e6   :  { %v3047_v23 = vadd.f32 1e-05, %v3043_v62 }
0x10e8   :  { %3463 = vrsqrt.f32 %v3047_v23  ;;  %vm3057_vm14 = vweird.f32 %v3047_v23 }
0x10eb   :  { %v3036_v36 = vpop.xlane.xlu0 %3035 }
0x10ec   :  { %v3044_v16 = vmul.f32 %v3036_v36, %v4020_v25 }
0x10ee   :  { %v3464_v22 = vpop.eup %3463  ;;  %v3048_v19 = vadd.f32 1e-05, %v3044_v16 }
0x10ef   :  { %v3052_v38 = vmul.f32 %v3464_v22, %v3047_v23  ;;  %vm3058_vm3 = vweird.f32 %v3464_v22 }
0x10f0   :  { %3465 = vrsqrt.f32 %v3048_v19  ;;  %vm3059_vm15 = vmor %vm3057_vm14, %vm3058_vm3  ;;  %vm3067_vm2 = vweird.f32 %v3048_v19 }
0x10f1   :  { %v3053_v18 = vmul.f32 %v3464_v22, %v3052_v38 }
0x10f3   :  { %v3054_v56 = vmul.f32 0.5, %v3053_v18 }
0x10f5   :  { %v3055_v34 = vsub.f32 1.5, %v3054_v56 }
0x10f6   :  { %v3466_v27 = vpop.eup %3465 }
0x10f7   :  { %v3056_v5 = vmul.f32 %v3464_v22, %v3055_v34  ;;  %v3062_v17 = vmul.f32 %v3466_v27, %v3048_v19  ;;  %vm3068_vm1 = vweird.f32 %v3466_v27 }
0x10f8   :  { %vm3069_vm4 = vmor %vm3067_vm2, %vm3068_vm1 }
0x10f9   :  { %v3060_v21 = vsel %vm3059_vm15, %v3464_v22, %v3056_v5  ;;  %v3063_v24 = vmul.f32 %v3466_v27, %v3062_v17 }
0x10fa   :  { %v3091_v37 = vmul.f32 %v3060_v21, %v3023_v44 }
0x10fb   :  { %v3064_v12 = vmul.f32 0.5, %v3063_v24 }
0x10fc   :  { %v3100_v61 = vmul.f32 %v3307_v54, %v3091_v37 }
0x10fd   :  { %v3065_v39 = vsub.f32 1.5, %v3064_v12 }
0x10fe   :  { %v3109_v28 = vadd.f32 %v3308_v15, %v3100_v61 }
0x10ff   :  { %v3066_v47 = vmul.f32 %v3466_v27, %v3065_v39 }
0x1100   :  { %3113 = vst.msk [vmem:[#allocation11] sm:$0xff] %vm140_vm0, %v3109_v28 }
0x1101   :  { %v3070_v29 = vsel %vm3069_vm4, %v3466_v27, %v3066_v47 }
0x1102   :  { %v3092_v45 = vmul.f32 %v3070_v29, %v3024_v42 }
0x1104   :  { %v3101_v1 = vmul.f32 %v3307_v54, %v3092_v45 }
0x1106   :  { %v3110_v0 = vadd.f32 %v3308_v15, %v3101_v1 }
0x1108   :  { %3114 = vst.msk [vmem:[#allocation11 + $0x8] sm:$0xff] %vm140_vm0, %v3110_v0 }
0x1116   :  { %v3039_v52 = vpop.xlane.xlu0 %3038 }
0x1117   :  { %v3045_v50 = vmul.f32 %v3039_v52, %v4020_v25 }
0x1119   :  { %v3049_v6 = vadd.f32 1e-05, %v3045_v50 }
0x111b   :  { %3467 = vrsqrt.f32 %v3049_v6  ;;  %vm3077_vm6 = vweird.f32 %v3049_v6 }
0x111e   :  { %v3042_v51 = vpop.xlane.xlu0 %3041 }
0x111f   :  { %v3046_v58 = vmul.f32 %v3042_v51, %v4020_v25 }
0x1121   :  { %v3468_v7 = vpop.eup %3467  ;;  %v3050_v32 = vadd.f32 1e-05, %v3046_v58 }
0x1122   :  { %v3072_v13 = vmul.f32 %v3468_v7, %v3049_v6  ;;  %vm3078_vm5 = vweird.f32 %v3468_v7 }
0x1123   :  { %3469 = vrsqrt.f32 %v3050_v32  ;;  %vm3079_vm7 = vmor %vm3077_vm6, %vm3078_vm5  ;;  %vm3087_vm9 = vweird.f32 %v3050_v32 }
0x1124   :  { %v3073_v41 = vmul.f32 %v3468_v7, %v3072_v13 }
0x1126   :  { %v3074_v60 = vmul.f32 0.5, %v3073_v41 }
0x1128   :  { %v3075_v43 = vsub.f32 1.5, %v3074_v60 }
0x1129   :  { %v3470_v11 = vpop.eup %3469 }
0x112a   :  { %v3076_v63 = vmul.f32 %v3468_v7, %v3075_v43  ;;  %v3082_v48 = vmul.f32 %v3470_v11, %v3050_v32  ;;  %vm3088_vm8 = vweird.f32 %v3470_v11 }
0x112b   :  { %vm3089_vm10 = vmor %vm3087_vm9, %vm3088_vm8 }
0x112c   :  { %v3080_v9 = vsel %vm3079_vm7, %v3468_v7, %v3076_v63  ;;  %v3083_v3 = vmul.f32 %v3470_v11, %v3082_v48 }
0x112d   :  { %v3093_v8 = vmul.f32 %v3080_v9, %v4522_v35 }
0x112e   :  { %v3084_v44 = vmul.f32 0.5, %v3083_v3 }
0x112f   :  { %v3102_v10 = vmul.f32 %v3307_v54, %v3093_v8 }
0x1130   :  { %v3085_v25 = vsub.f32 1.5, %v3084_v44 }
0x1131   :  { %v3111_v59 = vadd.f32 %v3308_v15, %v3102_v10 }
0x1132   :  { %v3086_v33 = vmul.f32 %v3470_v11, %v3085_v25 }
0x1133   :  { %3115 = vst.msk [vmem:[#allocation11 + $0x10] sm:$0xff] %vm140_vm0, %v3111_v59 }
0x1134   :  { %v3090_v20 = vsel %vm3089_vm10, %v3470_v11, %v3086_v33 }
0x1135   :  { %v3094_v42 = vmul.f32 %v3090_v20, %v4528_v55 }
0x1137   :  { %v3103_v57 = vmul.f32 %v3307_v54, %v3094_v42 }
0x1139   :  { %v3112_v30 = vadd.f32 %v3308_v15, %v3103_v57 }
0x113b   :  { %3116 = vst.msk [vmem:[#allocation11 + $0x18] sm:$0xff] %vm140_vm0, %v3112_v30 }
0x113c   :  { %3129 = dma.vmem_to_hbm [thread:$0]  %s3122_s17, 512, %s3124_s8, [#allocation4], %s3630_s15, %s3630_s15, %s3631_s16  }
0x113d   :  { %3623 = dma.done.wait [#allocation4], 512  }
0x113e   :  { %3624 = vsyncadd [#allocation4], 4294966784 }
0x113f   :  { %3134 = vsyncpa [#allocation3], 1 }
0x1140   :  { %3135 = vsyncpa [#allocation6], 1 }
0x1141   :  { %3136 = vsyncpa [#allocation9], 1 }
0x1142   :  { %3137 = vsyncpa [#allocation4], 1 }

</bundles_post_ra>
